<compile_context>
chip_gen: v6e
topology: v6e:2x2x1
jax: 0.10.0
libtpu: 0.0.40
codegen_flags: <defaults>
</compile_context>

<pallas_src>
import functools

import jax
import jax.numpy as jnp
from jax.experimental import pallas as pl
from jax.experimental.pallas import tpu as pltpu

NEG_SLOPE = 0.01  # nn.LeakyReLU default negative_slope
DP = 8            # coordinate dim 3 zero-padded to 8 (sublane aligned)


def _round_up(v, m):
    return ((v + m - 1) // m) * m


def _leaky_relu(x):
    # mul + max (2 VALU ops/elem) instead of cmp + mul + select (3).
    return jnp.maximum(x, NEG_SLOPE * x)


# --------------------------------------------------------------------------
# Kernel A: code projectors (all layers) + F-dependent half of map_t layer 1.
#   grid = (B,).   hf[b, 2l+j] = LeakyMLP_l(F[b]) @ W1f[2l+j] + (bp@W1p + b1)
# Kernel A is second-order cost-wise; the block-diagonal "3 big matmuls"
# restructure from the review is intentionally skipped for simplicity.
# --------------------------------------------------------------------------
def _code_hf_kernel(F_ref, cw1_ref, cb1_ref, cw2_ref, cb2_ref,
                    w1f_ref, bfold_ref, hf_ref, *, n_layers):
    f = F_ref[0]                                            # (M, C)
    for l in range(n_layers):
        h = jnp.dot(f, cw1_ref[l],
                    preferred_element_type=jnp.float32) + cb1_ref[l]
        h = _leaky_relu(h)
        fi = jnp.dot(h, cw2_ref[l],
                     preferred_element_type=jnp.float32) + cb2_ref[l]   # (M, C)
        for j in range(2):
            c = 2 * l + j
            hf_ref[0, c] = (jnp.dot(fi, w1f_ref[c],
                                    preferred_element_type=jnp.float32)
                            + bfold_ref[c])                  # (M, Hp)


# --------------------------------------------------------------------------
# Kernel B: all 2*L coupling layers fused; y stays resident in VMEM.
#   SoA layout: Y is (Dp, n_tile) with the point axis lane-dense.
#   Masks / projection / (1-mask) are pre-folded into W1k / W2k / b2k.
# --------------------------------------------------------------------------
def _coupling_stack_kernel(y_ref, hf_ref, w1_ref, w2_ref, b2_ref, o_ref,
                           *, n_coupling):
    y = y_ref[0, 0]                                          # (Dp, n_tile)
    hf = hf_ref[0, 0]                                        # (Hp, 2L)
    # NOTE: static unroll is fine for small 2L; switch to lax.fori_loop with
    # dynamic weight indexing if the number of couplings grows beyond ~8.
    for c in range(n_coupling):
        # first layer: MXU matmul (K = Dp), hF added via lane broadcast
        h = jnp.dot(w1_ref[c], y,
                    preferred_element_type=jnp.float32)       # (Hp, n_tile)
        h = _leaky_relu(h + hf[:, c:c + 1])
        # second layer (K = Hp) on the MXU; (1-mask) already folded into w2/b2
        t = jnp.dot(w2_ref[c], h,
                    preferred_element_type=jnp.float32)       # (Dp, n_tile)
        y = y - t - b2_ref[c]                                 # y1+(1-m)(y-t) == y-(1-m)t
    o_ref[0, 0] = y


# --------------------------------------------------------------------------
# Full NICE.forward
# --------------------------------------------------------------------------
def nice_forward(params, F, x, *, target_block_points=8192):
    B, M, C = F.shape
    B2, N, M2, D = x.shape
    assert B == B2 and M == M2 and D == 3

    layers = params["layers"]
    L = len(layers)
    nC = 2 * L
    H = layers[0]["cpl1"][2].shape[1]              # w1f: (C, H)
    Hp = _round_up(H, 128)
    hp = functools.partial(jnp.dot, precision=jax.lax.Precision.HIGHEST)

    # ---- stack & algebraically fold parameters (tiny, traced once) ----
    cw1 = jnp.stack([lp["code_proj"][0] for lp in layers])          # (L, C, C)
    cb1 = jnp.stack([lp["code_proj"][1] for lp in layers])          # (L, 1, C)
    cw2 = jnp.stack([lp["code_proj"][2] for lp in layers])          # (L, C, C)
    cb2 = jnp.stack([lp["code_proj"][3] for lp in layers])          # (L, 1, C)

    w1f_s, bfold_s, w1k_s, w2k_s, b2k_s = [], [], [], [], []
    for lp in layers:
        for mkey, ckey in (("mask1", "cpl1"), ("mask2", "cpl2")):
            wp, bp, w1f, w1p, b1, w2, b2 = lp[ckey]
            m = lp[mkey].reshape(3, 1)                              # (3, 1)
            padH = ((0, 0), (0, Hp - H))
            # F-dependent half of layer 1 (H padded to 128)
            w1f_s.append(jnp.pad(w1f, padH))                        # (C, Hp)
            bfold_s.append(jnp.pad(hp(bp, w1p) + b1, padH))         # (1, Hp)
            # mask + projection Linear folded into layer 1:
            #   (y*m) @ wp @ w1p == y @ (diag(m) wp w1p)
            w1k = jnp.pad(hp(m * wp, w1p), padH).T                  # (Hp, 3)
            w1k_s.append(jnp.pad(w1k, ((0, 0), (0, DP - 3))))       # (Hp, Dp)
            # (1-mask) folded into layer 2:  y_new = y - (1-m)*t
            w2k = jnp.pad((1.0 - m) * w2.T, padH)                   # (3, Hp)
            w2k_s.append(jnp.pad(w2k, ((0, DP - 3), (0, 0))))       # (Dp, Hp)
            b2k = (1.0 - m) * b2.T                                  # (3, 1)
            b2k_s.append(jnp.pad(b2k, ((0, DP - 3), (0, 0))))       # (Dp, 1)
    w1f_s = jnp.stack(w1f_s)                                        # (2L, C, Hp)
    bfold_s = jnp.stack(bfold_s)                                    # (2L, 1, Hp)
    w1k_s = jnp.stack(w1k_s)                                        # (2L, Hp, Dp)
    w2k_s = jnp.stack(w2k_s)                                        # (2L, Dp, Hp)
    b2k_s = jnp.stack(b2k_s)                                        # (2L, Dp, 1)

    # ---- kernel A: per-(b, m) code projections + folded hF ----
    hf_all = pl.pallas_call(
        functools.partial(_code_hf_kernel, n_layers=L),
        out_shape=jax.ShapeDtypeStruct((B, nC, M, Hp), jnp.float32),
        grid=(B,),
        in_specs=[
            pl.BlockSpec((1, M, C), lambda b: (b, 0, 0)),           # F
            pl.BlockSpec((L, C, C), lambda b: (0, 0, 0)),           # cw1
            pl.BlockSpec((L, 1, C), lambda b: (0, 0, 0)),           # cb1
            pl.BlockSpec((L, C, C), lambda b: (0, 0, 0)),           # cw2
            pl.BlockSpec((L, 1, C), lambda b: (0, 0, 0)),           # cb2
            pl.BlockSpec((nC, C, Hp), lambda b: (0, 0, 0)),         # w1f
            pl.BlockSpec((nC, 1, Hp), lambda b: (0, 0, 0)),         # bfold
        ],
        out_specs=pl.BlockSpec((1, nC, M, Hp), lambda b: (b, 0, 0, 0)),
        compiler_params=pltpu.CompilerParams(
            dimension_semantics=("parallel",)),
    )(F, cw1, cb1, cw2, cb2, w1f_s, bfold_s)

    # (B, nC, M, Hp) -> (B, M, Hp, nC): per-(b, m) column layout for kernel B.
    hf_bm = jnp.transpose(hf_all, (0, 2, 3, 1))

    # ---- kernel B: fused stack of 2L couplings, SoA lane-dense point tiles ----
    n_tile = min(_round_up(target_block_points, 128),
                 _round_up(max(N, 1), 128))
    Nb = pl.cdiv(N, n_tile)
    Np = Nb * n_tile

    # (B, N, M, 3) -> (B, M, Dp, Np): point axis on lanes, coords padded 3->8.
    xT = jnp.transpose(x, (0, 2, 3, 1))
    xT = jnp.pad(xT, ((0, 0), (0, 0), (0, DP - 3), (0, Np - N)))

    yT = pl.pallas_call(
        functools.partial(_coupling_stack_kernel, n_coupling=nC),
        out_shape=jax.ShapeDtypeStruct((B, M, DP, Np), jnp.float32),
        grid=(B, M, Nb),
        in_specs=[
            pl.BlockSpec((1, 1, DP, n_tile), lambda b, m, i: (b, m, 0, i)),  # y
            pl.BlockSpec((1, 1, Hp, nC), lambda b, m, i: (b, m, 0, 0)),      # hF
            pl.BlockSpec((nC, Hp, DP), lambda b, m, i: (0, 0, 0)),           # W1k
            pl.BlockSpec((nC, DP, Hp), lambda b, m, i: (0, 0, 0)),           # W2k
            pl.BlockSpec((nC, DP, 1), lambda b, m, i: (0, 0, 0)),            # b2k
        ],
        out_specs=pl.BlockSpec((1, 1, DP, n_tile), lambda b, m, i: (b, m, 0, i)),
        compiler_params=pltpu.CompilerParams(
            dimension_semantics=("parallel", "parallel", "parallel"),
            vmem_limit_bytes=32 * 1024 * 1024),
    )(xT, hf_bm, w1k_s, w2k_s, b2k_s)

    # back to (B, N, M, 3); drop coordinate / point padding.
    y = jnp.transpose(yT[:, :, :3, :N], (0, 3, 1, 2))
    # _normalize=False, _explicit_affine=False  ->  y / sigma + mu is identity.
    return y


# --------------------------------------------------------------------------
# Deterministic parameter init (shapes follow the PyTorch __init__)
# --------------------------------------------------------------------------
def init_params(key, n_layers, C, H, Pd):
    def dense(k, fan_in, fan_out):
        kw, kb = jax.random.split(k)
        w = jax.random.normal(kw, (fan_in, fan_out), jnp.float32) / jnp.sqrt(
            jnp.float32(fan_in))
        b = 0.01 * jax.random.normal(kb, (1, fan_out), jnp.float32)
        return w, b

    # deterministic stand-in for torch.randperm-based mask selection
    sel = [i % 3 for i in range(n_layers)]

    layers = []
    lkeys = jax.random.split(key, n_layers)
    for i in range(n_layers):
        ks = jax.random.split(lkeys[i], 8)
        mask2 = jnp.zeros((3,), jnp.float32).at[sel[i]].set(1.0).reshape(1, 3)
        mask1 = 1.0 - mask2

        cw1, cb1 = dense(ks[0], C, C)     # code projector: C -> C -> C
        cw2, cb2 = dense(ks[1], C, C)

        def coupling_params(k1, k2, k3):
            wp, bp = dense(k1, 3, Pd)               # projection Linear(3, Pd)
            w1, b1 = dense(k2, C + Pd, H)           # map_t hidden layer
            w2, b2 = dense(k3, H, 3)                # map_t output layer
            return (wp, bp, w1[:C], w1[C:], b1, w2, b2)

        layers.append(dict(
            mask1=mask1, mask2=mask2,
            code_proj=(cw1, cb1, cw2, cb2),
            cpl1=coupling_params(ks[2], ks[3], ks[4]),
            cpl2=coupling_params(ks[5], ks[6], ks[7]),
        ))
    return {"layers": layers}


# --------------------------------------------------------------------------
# Pure-JAX reference (follows the PyTorch forward literally)
# --------------------------------------------------------------------------
def ref_forward(params, F, x):
    B, M, C = F.shape
    _, N, _, _ = x.shape
    hp = lambda a, b: jnp.dot(a, b, precision=jax.lax.Precision.HIGHEST)

    y = x  # identity affine (R=I, t=0) under default flags
    for lp in params["layers"]:
        w1, b1, w2, b2 = lp["code_proj"]
        Fi = hp(_leaky_relu(hp(F, w1) + b1), w2) + b2          # (B, M, C)
        Fi = jnp.broadcast_to(Fi[:, None], (B, N, M, C))
        for mask, cp in ((lp["mask1"], lp["cpl1"]), (lp["mask2"], lp["cpl2"])):
            wp, bp, w1f, w1p, b1c, w2c, b2c = cp
            m = mask.reshape(1, 1, 1, 3)
            y1 = y * m
            p = hp(y1, wp) + bp
            h = _leaky_relu(hp(Fi, w1f) + hp(p, w1p) + b1c)
            t = hp(h, w2c) + b2c
            y = y1 + (1.0 - m) * (y - t)
    return y


if __name__ == "__main__":
    key = jax.random.PRNGKey(0)
    kF, kx, kp = jax.random.split(key, 3)

    # small shapes consistent with NICE.forward: F (B,M,C), x (B,N,M,3)
    B, N, M = 2, 8, 16
    C, H, Pd = 32, 64, 32          # feature_dims, hidden_size, proj_dims
    n_layers = 2

    F = jax.random.normal(kF, (B, M, C), jnp.float32)
    x = jax.random.normal(kx, (B, N, M, 3), jnp.float32)
    params = init_params(kp, n_layers, C, H, Pd)

    fwd = jax.jit(nice_forward)
    out = jax.block_until_ready(fwd(params, F, x))

    ref = ref_forward(params, F, x)
    assert out.shape == x.shape == ref.shape
    err = float(jnp.max(jnp.abs(out - ref)))
    # tolerance covers TPU default (bf16-pass) MXU matmul precision in-kernel
    assert jnp.allclose(out, ref, atol=3e-2, rtol=3e-2), err

    print("KERNEL_OK")
</pallas_src>

<mosaic_0001>
module attributes {stable_mosaic.version = 11 : i64} {
  func.func @_code_hf_kernel(%arg0: i32, %arg1: memref<1x16x32xf32, #tpu.memory_space<vmem>>, %arg2: memref<2x32x32xf32, #tpu.memory_space<vmem>>, %arg3: memref<2x1x32xf32, #tpu.memory_space<vmem>>, %arg4: memref<2x32x32xf32, #tpu.memory_space<vmem>>, %arg5: memref<2x1x32xf32, #tpu.memory_space<vmem>>, %arg6: memref<4x32x128xf32, #tpu.memory_space<vmem>>, %arg7: memref<4x1x128xf32, #tpu.memory_space<vmem>>, %arg8: memref<1x4x16x128xf32, #tpu.memory_space<vmem>>) attributes {dimension_semantics = [#tpu.dimension_semantics<parallel>], iteration_bounds = array<i64: 2>, scalar_prefetch = 0 : i64, scratch_operands = 0 : i64, tpu.core_type = #tpu.core_type<tc>, window_params = [{transform_indices = @transform_0, window_bounds = array<i64: 1, 16, 32>}, {pipeline_mode = #tpu.pipeline_mode<synchronous>, transform_indices = @transform_1, window_bounds = array<i64: 2, 32, 32>}, {pipeline_mode = #tpu.pipeline_mode<synchronous>, transform_indices = @transform_2, window_bounds = array<i64: 2, 1, 32>}, {pipeline_mode = #tpu.pipeline_mode<synchronous>, transform_indices = @transform_3, window_bounds = array<i64: 2, 32, 32>}, {pipeline_mode = #tpu.pipeline_mode<synchronous>, transform_indices = @transform_4, window_bounds = array<i64: 2, 1, 32>}, {pipeline_mode = #tpu.pipeline_mode<synchronous>, transform_indices = @transform_5, window_bounds = array<i64: 4, 32, 128>}, {pipeline_mode = #tpu.pipeline_mode<synchronous>, transform_indices = @transform_6, window_bounds = array<i64: 4, 1, 128>}, {transform_indices = @transform_7, window_bounds = array<i64: 1, 4, 16, 128>}]} {
    %c0 = arith.constant 0 : index
    %c0_0 = arith.constant 0 : index
    %c0_1 = arith.constant 0 : index
    %0 = vector.load %arg1[%c0, %c0_0, %c0_1] : memref<1x16x32xf32, #tpu.memory_space<vmem>>, vector<1x16x32xf32>
    %1 = vector.shape_cast %0 : vector<1x16x32xf32> to vector<16x32xf32>
    %c0_2 = arith.constant 0 : index
    %c0_3 = arith.constant 0 : index
    %c0_4 = arith.constant 0 : index
    %2 = vector.load %arg2[%c0_2, %c0_3, %c0_4] : memref<2x32x32xf32, #tpu.memory_space<vmem>>, vector<1x32x32xf32>
    %3 = vector.shape_cast %2 : vector<1x32x32xf32> to vector<32x32xf32>
    %cst = arith.constant dense<0.000000e+00> : vector<16x32xf32>
    %4 = tpu.matmul %1, %3, %cst {dimension_numbers = #tpu.dot_dimension_numbers<[1], [0], [0], [1], [0, 0, 1, 1], [], []>} : vector<16x32xf32>, vector<32x32xf32>, vector<16x32xf32> -> vector<16x32xf32>
    %c0_5 = arith.constant 0 : index
    %c0_6 = arith.constant 0 : index
    %c0_7 = arith.constant 0 : index
    %5 = vector.load %arg3[%c0_5, %c0_6, %c0_7] : memref<2x1x32xf32, #tpu.memory_space<vmem>>, vector<1x1x32xf32>
    %6 = vector.shape_cast %5 : vector<1x1x32xf32> to vector<1x32xf32>
    %7 = vector.broadcast %6 : vector<1x32xf32> to vector<16x32xf32>
    %8 = arith.addf %4, %7 : vector<16x32xf32>
    %cst_8 = arith.constant 0.00999999977 : f32
    %9 = vector.broadcast %cst_8 : f32 to vector<16x32xf32>
    %10 = arith.mulf %9, %8 : vector<16x32xf32>
    %11 = arith.maximumf %8, %10 : vector<16x32xf32>
    %c0_9 = arith.constant 0 : index
    %c0_10 = arith.constant 0 : index
    %c0_11 = arith.constant 0 : index
    %12 = vector.load %arg4[%c0_9, %c0_10, %c0_11] : memref<2x32x32xf32, #tpu.memory_space<vmem>>, vector<1x32x32xf32>
    %13 = vector.shape_cast %12 : vector<1x32x32xf32> to vector<32x32xf32>
    %cst_12 = arith.constant dense<0.000000e+00> : vector<16x32xf32>
    %14 = tpu.matmul %11, %13, %cst_12 {dimension_numbers = #tpu.dot_dimension_numbers<[1], [0], [0], [1], [0, 0, 1, 1], [], []>} : vector<16x32xf32>, vector<32x32xf32>, vector<16x32xf32> -> vector<16x32xf32>
    %c0_13 = arith.constant 0 : index
    %c0_14 = arith.constant 0 : index
    %c0_15 = arith.constant 0 : index
    %15 = vector.load %arg5[%c0_13, %c0_14, %c0_15] : memref<2x1x32xf32, #tpu.memory_space<vmem>>, vector<1x1x32xf32>
    %16 = vector.shape_cast %15 : vector<1x1x32xf32> to vector<1x32xf32>
    %17 = vector.broadcast %16 : vector<1x32xf32> to vector<16x32xf32>
    %18 = arith.addf %14, %17 : vector<16x32xf32>
    %c0_16 = arith.constant 0 : index
    %c0_17 = arith.constant 0 : index
    %c0_18 = arith.constant 0 : index
    %19 = vector.load %arg6[%c0_16, %c0_17, %c0_18] : memref<4x32x128xf32, #tpu.memory_space<vmem>>, vector<1x32x128xf32>
    %20 = vector.shape_cast %19 : vector<1x32x128xf32> to vector<32x128xf32>
    %cst_19 = arith.constant dense<0.000000e+00> : vector<16x128xf32>
    %21 = tpu.matmul %18, %20, %cst_19 {dimension_numbers = #tpu.dot_dimension_numbers<[1], [0], [0], [1], [0, 0, 1, 1], [], []>} : vector<16x32xf32>, vector<32x128xf32>, vector<16x128xf32> -> vector<16x128xf32>
    %c0_20 = arith.constant 0 : index
    %c0_21 = arith.constant 0 : index
    %c0_22 = arith.constant 0 : index
    %22 = vector.load %arg7[%c0_20, %c0_21, %c0_22] : memref<4x1x128xf32, #tpu.memory_space<vmem>>, vector<1x1x128xf32>
    %23 = vector.shape_cast %22 : vector<1x1x128xf32> to vector<1x128xf32>
    %24 = vector.broadcast %23 : vector<1x128xf32> to vector<16x128xf32>
    %25 = arith.addf %21, %24 : vector<16x128xf32>
    %c0_23 = arith.constant 0 : index
    %c0_24 = arith.constant 0 : index
    %c0_25 = arith.constant 0 : index
    %c0_26 = arith.constant 0 : index
    %26 = vector.load %arg8[%c0_23, %c0_24, %c0_25, %c0_26] : memref<1x4x16x128xf32, #tpu.memory_space<vmem>>, vector<1x1x16x128xf32>
    %27 = vector.shape_cast %26 : vector<1x1x16x128xf32> to vector<16x128xf32>
    %28 = vector.shape_cast %25 : vector<16x128xf32> to vector<1x1x16x128xf32>
    tpu.vector_store %arg8[%c0_23, %c0_24, %c0_25, %c0_26], %28 {strides = array<i32>} : memref<1x4x16x128xf32, #tpu.memory_space<vmem>>, vector<1x1x16x128xf32>,
    %c1 = arith.constant 1 : index
    %c0_27 = arith.constant 0 : index
    %c0_28 = arith.constant 0 : index
    %29 = vector.load %arg6[%c1, %c0_27, %c0_28] : memref<4x32x128xf32, #tpu.memory_space<vmem>>, vector<1x32x128xf32>
    %30 = vector.shape_cast %29 : vector<1x32x128xf32> to vector<32x128xf32>
    %cst_29 = arith.constant dense<0.000000e+00> : vector<16x128xf32>
    %31 = tpu.matmul %18, %30, %cst_29 {dimension_numbers = #tpu.dot_dimension_numbers<[1], [0], [0], [1], [0, 0, 1, 1], [], []>} : vector<16x32xf32>, vector<32x128xf32>, vector<16x128xf32> -> vector<16x128xf32>
    %c1_30 = arith.constant 1 : index
    %c0_31 = arith.constant 0 : index
    %c0_32 = arith.constant 0 : index
    %32 = vector.load %arg7[%c1_30, %c0_31, %c0_32] : memref<4x1x128xf32, #tpu.memory_space<vmem>>, vector<1x1x128xf32>
    %33 = vector.shape_cast %32 : vector<1x1x128xf32> to vector<1x128xf32>
    %34 = vector.broadcast %33 : vector<1x128xf32> to vector<16x128xf32>
    %35 = arith.addf %31, %34 : vector<16x128xf32>
    %c0_33 = arith.constant 0 : index
    %c1_34 = arith.constant 1 : index
    %c0_35 = arith.constant 0 : index
    %c0_36 = arith.constant 0 : index
    %36 = vector.load %arg8[%c0_33, %c1_34, %c0_35, %c0_36] : memref<1x4x16x128xf32, #tpu.memory_space<vmem>>, vector<1x1x16x128xf32>
    %37 = vector.shape_cast %36 : vector<1x1x16x128xf32> to vector<16x128xf32>
    %38 = vector.shape_cast %35 : vector<16x128xf32> to vector<1x1x16x128xf32>
    tpu.vector_store %arg8[%c0_33, %c1_34, %c0_35, %c0_36], %38 {strides = array<i32>} : memref<1x4x16x128xf32, #tpu.memory_space<vmem>>, vector<1x1x16x128xf32>,
    %c1_37 = arith.constant 1 : index
    %c0_38 = arith.constant 0 : index
    %c0_39 = arith.constant 0 : index
    %39 = vector.load %arg2[%c1_37, %c0_38, %c0_39] : memref<2x32x32xf32, #tpu.memory_space<vmem>>, vector<1x32x32xf32>
    %40 = vector.shape_cast %39 : vector<1x32x32xf32> to vector<32x32xf32>
    %cst_40 = arith.constant dense<0.000000e+00> : vector<16x32xf32>
    %41 = tpu.matmul %1, %40, %cst_40 {dimension_numbers = #tpu.dot_dimension_numbers<[1], [0], [0], [1], [0, 0, 1, 1], [], []>} : vector<16x32xf32>, vector<32x32xf32>, vector<16x32xf32> -> vector<16x32xf32>
    %c1_41 = arith.constant 1 : index
    %c0_42 = arith.constant 0 : index
    %c0_43 = arith.constant 0 : index
    %42 = vector.load %arg3[%c1_41, %c0_42, %c0_43] : memref<2x1x32xf32, #tpu.memory_space<vmem>>, vector<1x1x32xf32>
    %43 = vector.shape_cast %42 : vector<1x1x32xf32> to vector<1x32xf32>
    %44 = vector.broadcast %43 : vector<1x32xf32> to vector<16x32xf32>
    %45 = arith.addf %41, %44 : vector<16x32xf32>
    %cst_44 = arith.constant 0.00999999977 : f32
    %46 = vector.broadcast %cst_44 : f32 to vector<16x32xf32>
    %47 = arith.mulf %46, %45 : vector<16x32xf32>
    %48 = arith.maximumf %45, %47 : vector<16x32xf32>
    %c1_45 = arith.constant 1 : index
    %c0_46 = arith.constant 0 : index
    %c0_47 = arith.constant 0 : index
    %49 = vector.load %arg4[%c1_45, %c0_46, %c0_47] : memref<2x32x32xf32, #tpu.memory_space<vmem>>, vector<1x32x32xf32>
    %50 = vector.shape_cast %49 : vector<1x32x32xf32> to vector<32x32xf32>
    %cst_48 = arith.constant dense<0.000000e+00> : vector<16x32xf32>
    %51 = tpu.matmul %48, %50, %cst_48 {dimension_numbers = #tpu.dot_dimension_numbers<[1], [0], [0], [1], [0, 0, 1, 1], [], []>} : vector<16x32xf32>, vector<32x32xf32>, vector<16x32xf32> -> vector<16x32xf32>
    %c1_49 = arith.constant 1 : index
    %c0_50 = arith.constant 0 : index
    %c0_51 = arith.constant 0 : index
    %52 = vector.load %arg5[%c1_49, %c0_50, %c0_51] : memref<2x1x32xf32, #tpu.memory_space<vmem>>, vector<1x1x32xf32>
    %53 = vector.shape_cast %52 : vector<1x1x32xf32> to vector<1x32xf32>
    %54 = vector.broadcast %53 : vector<1x32xf32> to vector<16x32xf32>
    %55 = arith.addf %51, %54 : vector<16x32xf32>
    %c2 = arith.constant 2 : index
    %c0_52 = arith.constant 0 : index
    %c0_53 = arith.constant 0 : index
    %56 = vector.load %arg6[%c2, %c0_52, %c0_53] : memref<4x32x128xf32, #tpu.memory_space<vmem>>, vector<1x32x128xf32>
    %57 = vector.shape_cast %56 : vector<1x32x128xf32> to vector<32x128xf32>
    %cst_54 = arith.constant dense<0.000000e+00> : vector<16x128xf32>
    %58 = tpu.matmul %55, %57, %cst_54 {dimension_numbers = #tpu.dot_dimension_numbers<[1], [0], [0], [1], [0, 0, 1, 1], [], []>} : vector<16x32xf32>, vector<32x128xf32>, vector<16x128xf32> -> vector<16x128xf32>
    %c2_55 = arith.constant 2 : index
    %c0_56 = arith.constant 0 : index
    %c0_57 = arith.constant 0 : index
    %59 = vector.load %arg7[%c2_55, %c0_56, %c0_57] : memref<4x1x128xf32, #tpu.memory_space<vmem>>, vector<1x1x128xf32>
    %60 = vector.shape_cast %59 : vector<1x1x128xf32> to vector<1x128xf32>
    %61 = vector.broadcast %60 : vector<1x128xf32> to vector<16x128xf32>
    %62 = arith.addf %58, %61 : vector<16x128xf32>
    %c0_58 = arith.constant 0 : index
    %c2_59 = arith.constant 2 : index
    %c0_60 = arith.constant 0 : index
    %c0_61 = arith.constant 0 : index
    %63 = vector.load %arg8[%c0_58, %c2_59, %c0_60, %c0_61] : memref<1x4x16x128xf32, #tpu.memory_space<vmem>>, vector<1x1x16x128xf32>
    %64 = vector.shape_cast %63 : vector<1x1x16x128xf32> to vector<16x128xf32>
    %65 = vector.shape_cast %62 : vector<16x128xf32> to vector<1x1x16x128xf32>
    tpu.vector_store %arg8[%c0_58, %c2_59, %c0_60, %c0_61], %65 {strides = array<i32>} : memref<1x4x16x128xf32, #tpu.memory_space<vmem>>, vector<1x1x16x128xf32>,
    %c3 = arith.constant 3 : index
    %c0_62 = arith.constant 0 : index
    %c0_63 = arith.constant 0 : index
    %66 = vector.load %arg6[%c3, %c0_62, %c0_63] : memref<4x32x128xf32, #tpu.memory_space<vmem>>, vector<1x32x128xf32>
    %67 = vector.shape_cast %66 : vector<1x32x128xf32> to vector<32x128xf32>
    %cst_64 = arith.constant dense<0.000000e+00> : vector<16x128xf32>
    %68 = tpu.matmul %55, %67, %cst_64 {dimension_numbers = #tpu.dot_dimension_numbers<[1], [0], [0], [1], [0, 0, 1, 1], [], []>} : vector<16x32xf32>, vector<32x128xf32>, vector<16x128xf32> -> vector<16x128xf32>
    %c3_65 = arith.constant 3 : index
    %c0_66 = arith.constant 0 : index
    %c0_67 = arith.constant 0 : index
    %69 = vector.load %arg7[%c3_65, %c0_66, %c0_67] : memref<4x1x128xf32, #tpu.memory_space<vmem>>, vector<1x1x128xf32>
    %70 = vector.shape_cast %69 : vector<1x1x128xf32> to vector<1x128xf32>
    %71 = vector.broadcast %70 : vector<1x128xf32> to vector<16x128xf32>
    %72 = arith.addf %68, %71 : vector<16x128xf32>
    %c0_68 = arith.constant 0 : index
    %c3_69 = arith.constant 3 : index
    %c0_70 = arith.constant 0 : index
    %c0_71 = arith.constant 0 : index
    %73 = vector.load %arg8[%c0_68, %c3_69, %c0_70, %c0_71] : memref<1x4x16x128xf32, #tpu.memory_space<vmem>>, vector<1x1x16x128xf32>
    %74 = vector.shape_cast %73 : vector<1x1x16x128xf32> to vector<16x128xf32>
    %75 = vector.shape_cast %72 : vector<16x128xf32> to vector<1x1x16x128xf32>
    tpu.vector_store %arg8[%c0_68, %c3_69, %c0_70, %c0_71], %75 {strides = array<i32>} : memref<1x4x16x128xf32, #tpu.memory_space<vmem>>, vector<1x1x16x128xf32>,
    return
  }
  func.func @transform_0(%arg0: i32) -> (i32, i32, i32) {
    %c0_i32 = arith.constant 0 : i32
    %c0_i32_0 = arith.constant 0 : i32
    %c0_i32_1 = arith.constant 0 : i32
    return %arg0, %c0_i32, %c0_i32_0 : i32, i32, i32
  }
  func.func @transform_1(%arg0: i32) -> (i32, i32, i32) {
    %c0_i32 = arith.constant 0 : i32
    %c0_i32_0 = arith.constant 0 : i32
    %c0_i32_1 = arith.constant 0 : i32
    %c0_i32_2 = arith.constant 0 : i32
    return %c0_i32, %c0_i32_0, %c0_i32_1 : i32, i32, i32
  }
  func.func @transform_2(%arg0: i32) -> (i32, i32, i32) {
    %c0_i32 = arith.constant 0 : i32
    %c0_i32_0 = arith.constant 0 : i32
    %c0_i32_1 = arith.constant 0 : i32
    %c0_i32_2 = arith.constant 0 : i32
    return %c0_i32, %c0_i32_0, %c0_i32_1 : i32, i32, i32
  }
  func.func @transform_3(%arg0: i32) -> (i32, i32, i32) {
    %c0_i32 = arith.constant 0 : i32
    %c0_i32_0 = arith.constant 0 : i32
    %c0_i32_1 = arith.constant 0 : i32
    %c0_i32_2 = arith.constant 0 : i32
    return %c0_i32, %c0_i32_0, %c0_i32_1 : i32, i32, i32
  }
  func.func @transform_4(%arg0: i32) -> (i32, i32, i32) {
    %c0_i32 = arith.constant 0 : i32
    %c0_i32_0 = arith.constant 0 : i32
    %c0_i32_1 = arith.constant 0 : i32
    %c0_i32_2 = arith.constant 0 : i32
    return %c0_i32, %c0_i32_0, %c0_i32_1 : i32, i32, i32
  }
  func.func @transform_5(%arg0: i32) -> (i32, i32, i32) {
    %c0_i32 = arith.constant 0 : i32
    %c0_i32_0 = arith.constant 0 : i32
    %c0_i32_1 = arith.constant 0 : i32
    %c0_i32_2 = arith.constant 0 : i32
    return %c0_i32, %c0_i32_0, %c0_i32_1 : i32, i32, i32
  }
  func.func @transform_6(%arg0: i32) -> (i32, i32, i32) {
    %c0_i32 = arith.constant 0 : i32
    %c0_i32_0 = arith.constant 0 : i32
    %c0_i32_1 = arith.constant 0 : i32
    %c0_i32_2 = arith.constant 0 : i32
    return %c0_i32, %c0_i32_0, %c0_i32_1 : i32, i32, i32
  }
  func.func @transform_7(%arg0: i32) -> (i32, i32, i32, i32) {
    %c0_i32 = arith.constant 0 : i32
    %c0_i32_0 = arith.constant 0 : i32
    %c0_i32_1 = arith.constant 0 : i32
    %c0_i32_2 = arith.constant 0 : i32
    return %arg0, %c0_i32, %c0_i32_0, %c0_i32_1 : i32, i32, i32, i32
  }
}

module attributes {stable_mosaic.version = 11 : i64} {
  func.func @_coupling_stack_kernel(%arg0: i32, %arg1: i32, %arg2: i32, %arg3: memref<1x1x8x128xf32, #tpu.memory_space<vmem>>, %arg4: memref<1x1x128x4xf32, #tpu.memory_space<vmem>>, %arg5: memref<4x128x8xf32, #tpu.memory_space<vmem>>, %arg6: memref<4x8x128xf32, #tpu.memory_space<vmem>>, %arg7: memref<4x8x1xf32, #tpu.memory_space<vmem>>, %arg8: memref<1x1x8x128xf32, #tpu.memory_space<vmem>>) attributes {dimension_semantics = [#tpu.dimension_semantics<parallel>, #tpu.dimension_semantics<parallel>, #tpu.dimension_semantics<parallel>], iteration_bounds = array<i64: 2, 16, 1>, scalar_prefetch = 0 : i64, scratch_operands = 0 : i64, tpu.core_type = #tpu.core_type<tc>, window_params = [{transform_indices = @transform_0, window_bounds = array<i64: 1, 1, 8, 128>}, {transform_indices = @transform_1, window_bounds = array<i64: 1, 1, 128, 4>}, {pipeline_mode = #tpu.pipeline_mode<synchronous>, transform_indices = @transform_2, window_bounds = array<i64: 4, 128, 8>}, {pipeline_mode = #tpu.pipeline_mode<synchronous>, transform_indices = @transform_3, window_bounds = array<i64: 4, 8, 128>}, {pipeline_mode = #tpu.pipeline_mode<synchronous>, transform_indices = @transform_4, window_bounds = array<i64: 4, 8, 1>}, {transform_indices = @transform_5, window_bounds = array<i64: 1, 1, 8, 128>}]} {
    %c0 = arith.constant 0 : index
    %c0_0 = arith.constant 0 : index
    %c0_1 = arith.constant 0 : index
    %c0_2 = arith.constant 0 : index
    %0 = vector.load %arg3[%c0, %c0_0, %c0_1, %c0_2] : memref<1x1x8x128xf32, #tpu.memory_space<vmem>>, vector<1x1x8x128xf32>
    %1 = vector.shape_cast %0 : vector<1x1x8x128xf32> to vector<8x128xf32>
    %c0_3 = arith.constant 0 : index
    %c0_4 = arith.constant 0 : index
    %c0_5 = arith.constant 0 : index
    %c0_6 = arith.constant 0 : index
    %2 = vector.load %arg4[%c0_3, %c0_4, %c0_5, %c0_6] : memref<1x1x128x4xf32, #tpu.memory_space<vmem>>, vector<1x1x128x4xf32>
    %3 = vector.shape_cast %2 : vector<1x1x128x4xf32> to vector<128x4xf32>
    %c0_7 = arith.constant 0 : index
    %c0_8 = arith.constant 0 : index
    %c0_9 = arith.constant 0 : index
    %4 = vector.load %arg5[%c0_7, %c0_8, %c0_9] : memref<4x128x8xf32, #tpu.memory_space<vmem>>, vector<1x128x8xf32>
    %5 = vector.shape_cast %4 : vector<1x128x8xf32> to vector<128x8xf32>
    %cst = arith.constant dense<0.000000e+00> : vector<128x128xf32>
    %6 = tpu.matmul %5, %1, %cst {dimension_numbers = #tpu.dot_dimension_numbers<[1], [0], [0], [1], [0, 0, 1, 1], [], []>} : vector<128x8xf32>, vector<8x128xf32>, vector<128x128xf32> -> vector<128x128xf32>
    %7 = vector.extract_strided_slice %3 {offsets = [0, 0], sizes = [128, 1], strides = [1, 1]} : vector<128x4xf32> to vector<128x1xf32>
    %8 = vector.broadcast %7 : vector<128x1xf32> to vector<128x128xf32>
    %9 = arith.addf %6, %8 : vector<128x128xf32>
    %cst_10 = arith.constant 0.00999999977 : f32
    %10 = vector.broadcast %cst_10 : f32 to vector<128x128xf32>
    %11 = arith.mulf %10, %9 : vector<128x128xf32>
    %12 = arith.maximumf %9, %11 : vector<128x128xf32>
    %c0_11 = arith.constant 0 : index
    %c0_12 = arith.constant 0 : index
    %c0_13 = arith.constant 0 : index
    %13 = vector.load %arg6[%c0_11, %c0_12, %c0_13] : memref<4x8x128xf32, #tpu.memory_space<vmem>>, vector<1x8x128xf32>
    %14 = vector.shape_cast %13 : vector<1x8x128xf32> to vector<8x128xf32>
    %cst_14 = arith.constant dense<0.000000e+00> : vector<8x128xf32>
    %15 = tpu.matmul %14, %12, %cst_14 {dimension_numbers = #tpu.dot_dimension_numbers<[1], [0], [0], [1], [0, 0, 1, 1], [], []>} : vector<8x128xf32>, vector<128x128xf32>, vector<8x128xf32> -> vector<8x128xf32>
    %16 = arith.subf %1, %15 : vector<8x128xf32>
    %c0_15 = arith.constant 0 : index
    %c0_16 = arith.constant 0 : index
    %c0_17 = arith.constant 0 : index
    %17 = vector.load %arg7[%c0_15, %c0_16, %c0_17] : memref<4x8x1xf32, #tpu.memory_space<vmem>>, vector<1x8x1xf32>
    %18 = vector.shape_cast %17 : vector<1x8x1xf32> to vector<8x1xf32>
    %19 = vector.broadcast %18 : vector<8x1xf32> to vector<8x128xf32>
    %20 = arith.subf %16, %19 : vector<8x128xf32>
    %c1 = arith.constant 1 : index
    %c0_18 = arith.constant 0 : index
    %c0_19 = arith.constant 0 : index
    %21 = vector.load %arg5[%c1, %c0_18, %c0_19] : memref<4x128x8xf32, #tpu.memory_space<vmem>>, vector<1x128x8xf32>
    %22 = vector.shape_cast %21 : vector<1x128x8xf32> to vector<128x8xf32>
    %cst_20 = arith.constant dense<0.000000e+00> : vector<128x128xf32>
    %23 = tpu.matmul %22, %20, %cst_20 {dimension_numbers = #tpu.dot_dimension_numbers<[1], [0], [0], [1], [0, 0, 1, 1], [], []>} : vector<128x8xf32>, vector<8x128xf32>, vector<128x128xf32> -> vector<128x128xf32>
    %24 = vector.extract_strided_slice %3 {offsets = [0, 1], sizes = [128, 1], strides = [1, 1]} : vector<128x4xf32> to vector<128x1xf32>
    %25 = vector.broadcast %24 : vector<128x1xf32> to vector<128x128xf32>
    %26 = arith.addf %23, %25 : vector<128x128xf32>
    %cst_21 = arith.constant 0.00999999977 : f32
    %27 = vector.broadcast %cst_21 : f32 to vector<128x128xf32>
    %28 = arith.mulf %27, %26 : vector<128x128xf32>
    %29 = arith.maximumf %26, %28 : vector<128x128xf32>
    %c1_22 = arith.constant 1 : index
    %c0_23 = arith.constant 0 : index
    %c0_24 = arith.constant 0 : index
    %30 = vector.load %arg6[%c1_22, %c0_23, %c0_24] : memref<4x8x128xf32, #tpu.memory_space<vmem>>, vector<1x8x128xf32>
    %31 = vector.shape_cast %30 : vector<1x8x128xf32> to vector<8x128xf32>
    %cst_25 = arith.constant dense<0.000000e+00> : vector<8x128xf32>
    %32 = tpu.matmul %31, %29, %cst_25 {dimension_numbers = #tpu.dot_dimension_numbers<[1], [0], [0], [1], [0, 0, 1, 1], [], []>} : vector<8x128xf32>, vector<128x128xf32>, vector<8x128xf32> -> vector<8x128xf32>
    %33 = arith.subf %20, %32 : vector<8x128xf32>
    %c1_26 = arith.constant 1 : index
    %c0_27 = arith.constant 0 : index
    %c0_28 = arith.constant 0 : index
    %34 = vector.load %arg7[%c1_26, %c0_27, %c0_28] : memref<4x8x1xf32, #tpu.memory_space<vmem>>, vector<1x8x1xf32>
    %35 = vector.shape_cast %34 : vector<1x8x1xf32> to vector<8x1xf32>
    %36 = vector.broadcast %35 : vector<8x1xf32> to vector<8x128xf32>
    %37 = arith.subf %33, %36 : vector<8x128xf32>
    %c2 = arith.constant 2 : index
    %c0_29 = arith.constant 0 : index
    %c0_30 = arith.constant 0 : index
    %38 = vector.load %arg5[%c2, %c0_29, %c0_30] : memref<4x128x8xf32, #tpu.memory_space<vmem>>, vector<1x128x8xf32>
    %39 = vector.shape_cast %38 : vector<1x128x8xf32> to vector<128x8xf32>
    %cst_31 = arith.constant dense<0.000000e+00> : vector<128x128xf32>
    %40 = tpu.matmul %39, %37, %cst_31 {dimension_numbers = #tpu.dot_dimension_numbers<[1], [0], [0], [1], [0, 0, 1, 1], [], []>} : vector<128x8xf32>, vector<8x128xf32>, vector<128x128xf32> -> vector<128x128xf32>
    %41 = vector.extract_strided_slice %3 {offsets = [0, 2], sizes = [128, 1], strides = [1, 1]} : vector<128x4xf32> to vector<128x1xf32>
    %42 = vector.broadcast %41 : vector<128x1xf32> to vector<128x128xf32>
    %43 = arith.addf %40, %42 : vector<128x128xf32>
    %cst_32 = arith.constant 0.00999999977 : f32
    %44 = vector.broadcast %cst_32 : f32 to vector<128x128xf32>
    %45 = arith.mulf %44, %43 : vector<128x128xf32>
    %46 = arith.maximumf %43, %45 : vector<128x128xf32>
    %c2_33 = arith.constant 2 : index
    %c0_34 = arith.constant 0 : index
    %c0_35 = arith.constant 0 : index
    %47 = vector.load %arg6[%c2_33, %c0_34, %c0_35] : memref<4x8x128xf32, #tpu.memory_space<vmem>>, vector<1x8x128xf32>
    %48 = vector.shape_cast %47 : vector<1x8x128xf32> to vector<8x128xf32>
    %cst_36 = arith.constant dense<0.000000e+00> : vector<8x128xf32>
    %49 = tpu.matmul %48, %46, %cst_36 {dimension_numbers = #tpu.dot_dimension_numbers<[1], [0], [0], [1], [0, 0, 1, 1], [], []>} : vector<8x128xf32>, vector<128x128xf32>, vector<8x128xf32> -> vector<8x128xf32>
    %50 = arith.subf %37, %49 : vector<8x128xf32>
    %c2_37 = arith.constant 2 : index
    %c0_38 = arith.constant 0 : index
    %c0_39 = arith.constant 0 : index
    %51 = vector.load %arg7[%c2_37, %c0_38, %c0_39] : memref<4x8x1xf32, #tpu.memory_space<vmem>>, vector<1x8x1xf32>
    %52 = vector.shape_cast %51 : vector<1x8x1xf32> to vector<8x1xf32>
    %53 = vector.broadcast %52 : vector<8x1xf32> to vector<8x128xf32>
    %54 = arith.subf %50, %53 : vector<8x128xf32>
    %c3 = arith.constant 3 : index
    %c0_40 = arith.constant 0 : index
    %c0_41 = arith.constant 0 : index
    %55 = vector.load %arg5[%c3, %c0_40, %c0_41] : memref<4x128x8xf32, #tpu.memory_space<vmem>>, vector<1x128x8xf32>
    %56 = vector.shape_cast %55 : vector<1x128x8xf32> to vector<128x8xf32>
    %cst_42 = arith.constant dense<0.000000e+00> : vector<128x128xf32>
    %57 = tpu.matmul %56, %54, %cst_42 {dimension_numbers = #tpu.dot_dimension_numbers<[1], [0], [0], [1], [0, 0, 1, 1], [], []>} : vector<128x8xf32>, vector<8x128xf32>, vector<128x128xf32> -> vector<128x128xf32>
    %58 = vector.extract_strided_slice %3 {offsets = [0, 3], sizes = [128, 1], strides = [1, 1]} : vector<128x4xf32> to vector<128x1xf32>
    %59 = vector.broadcast %58 : vector<128x1xf32> to vector<128x128xf32>
    %60 = arith.addf %57, %59 : vector<128x128xf32>
    %cst_43 = arith.constant 0.00999999977 : f32
    %61 = vector.broadcast %cst_43 : f32 to vector<128x128xf32>
    %62 = arith.mulf %61, %60 : vector<128x128xf32>
    %63 = arith.maximumf %60, %62 : vector<128x128xf32>
    %c3_44 = arith.constant 3 : index
    %c0_45 = arith.constant 0 : index
    %c0_46 = arith.constant 0 : index
    %64 = vector.load %arg6[%c3_44, %c0_45, %c0_46] : memref<4x8x128xf32, #tpu.memory_space<vmem>>, vector<1x8x128xf32>
    %65 = vector.shape_cast %64 : vector<1x8x128xf32> to vector<8x128xf32>
    %cst_47 = arith.constant dense<0.000000e+00> : vector<8x128xf32>
    %66 = tpu.matmul %65, %63, %cst_47 {dimension_numbers = #tpu.dot_dimension_numbers<[1], [0], [0], [1], [0, 0, 1, 1], [], []>} : vector<8x128xf32>, vector<128x128xf32>, vector<8x128xf32> -> vector<8x128xf32>
    %67 = arith.subf %54, %66 : vector<8x128xf32>
    %c3_48 = arith.constant 3 : index
    %c0_49 = arith.constant 0 : index
    %c0_50 = arith.constant 0 : index
    %68 = vector.load %arg7[%c3_48, %c0_49, %c0_50] : memref<4x8x1xf32, #tpu.memory_space<vmem>>, vector<1x8x1xf32>
    %69 = vector.shape_cast %68 : vector<1x8x1xf32> to vector<8x1xf32>
    %70 = vector.broadcast %69 : vector<8x1xf32> to vector<8x128xf32>
    %71 = arith.subf %67, %70 : vector<8x128xf32>
    %c0_51 = arith.constant 0 : index
    %c0_52 = arith.constant 0 : index
    %c0_53 = arith.constant 0 : index
    %c0_54 = arith.constant 0 : index
    %72 = vector.load %arg8[%c0_51, %c0_52, %c0_53, %c0_54] : memref<1x1x8x128xf32, #tpu.memory_space<vmem>>, vector<1x1x8x128xf32>
    %73 = vector.shape_cast %72 : vector<1x1x8x128xf32> to vector<8x128xf32>
    %74 = vector.shape_cast %71 : vector<8x128xf32> to vector<1x1x8x128xf32>
    tpu.vector_store %arg8[%c0_51, %c0_52, %c0_53, %c0_54], %74 {strides = array<i32>} : memref<1x1x8x128xf32, #tpu.memory_space<vmem>>, vector<1x1x8x128xf32>,
    return
  }
  func.func @transform_0(%arg0: i32, %arg1: i32, %arg2: i32) -> (i32, i32, i32, i32) {
    %c0_i32 = arith.constant 0 : i32
    %c0_i32_0 = arith.constant 0 : i32
    return %arg0, %arg1, %c0_i32, %arg2 : i32, i32, i32, i32
  }
  func.func @transform_1(%arg0: i32, %arg1: i32, %arg2: i32) -> (i32, i32, i32, i32) {
    %c0_i32 = arith.constant 0 : i32
    %c0_i32_0 = arith.constant 0 : i32
    %c0_i32_1 = arith.constant 0 : i32
    return %arg0, %arg1, %c0_i32, %c0_i32_0 : i32, i32, i32, i32
  }
  func.func @transform_2(%arg0: i32, %arg1: i32, %arg2: i32) -> (i32, i32, i32) {
    %c0_i32 = arith.constant 0 : i32
    %c0_i32_0 = arith.constant 0 : i32
    %c0_i32_1 = arith.constant 0 : i32
    %c0_i32_2 = arith.constant 0 : i32
    return %c0_i32, %c0_i32_0, %c0_i32_1 : i32, i32, i32
  }
  func.func @transform_3(%arg0: i32, %arg1: i32, %arg2: i32) -> (i32, i32, i32) {
    %c0_i32 = arith.constant 0 : i32
    %c0_i32_0 = arith.constant 0 : i32
    %c0_i32_1 = arith.constant 0 : i32
    %c0_i32_2 = arith.constant 0 : i32
    return %c0_i32, %c0_i32_0, %c0_i32_1 : i32, i32, i32
  }
  func.func @transform_4(%arg0: i32, %arg1: i32, %arg2: i32) -> (i32, i32, i32) {
    %c0_i32 = arith.constant 0 : i32
    %c0_i32_0 = arith.constant 0 : i32
    %c0_i32_1 = arith.constant 0 : i32
    %c0_i32_2 = arith.constant 0 : i32
    return %c0_i32, %c0_i32_0, %c0_i32_1 : i32, i32, i32
  }
  func.func @transform_5(%arg0: i32, %arg1: i32, %arg2: i32) -> (i32, i32, i32, i32) {
    %c0_i32 = arith.constant 0 : i32
    %c0_i32_0 = arith.constant 0 : i32
    return %arg0, %arg1, %c0_i32, %arg2 : i32, i32, i32, i32
  }
}

</mosaic_0001>

<bundles_post_ra>
// kernel: nice_forward.2
= control target key start
LH: loop header
LB: loop body
LE: loop exit
PB: predicated region body
PF: predicated region fallthrough
CT: control target
= control target key end

     0   :  { %12 = vsyncpa [#allocation3], 0  ;;  %s1724_s0 = inlined_call_operand.hbm [shape: f32[2,16,32], index: 0, kind: input, shape index: {}]   ;;  %s1725_s1 = inlined_call_operand.vmem [shape: f32[2,32,32], index: 1, kind: input, shape index: {}]   ;;  %s1726_s2 = inlined_call_operand.vmem [shape: f32[2,1,32], index: 2, kind: input, shape index: {}]   ;;  %s1727_s3 = inlined_call_operand.vmem [shape: f32[2,32,32], index: 3, kind: input, shape index: {}]   ;;  %s1728_s4 = inlined_call_operand.vmem [shape: f32[2,1,32], index: 4, kind: input, shape index: {}]   ;;  %s1729_s5 = inlined_call_operand.vmem [shape: f32[4,32,128], index: 5, kind: input, shape index: {}]   ;;  %s1730_s6 = inlined_call_operand.vmem [shape: f32[4,1,128], index: 6, kind: input, shape index: {}]   ;;  %s1731_s7 = inlined_call_operand.vmem [shape: f32[2,4,16,128], index: 7, kind: output, shape index: {}]  }
   0x1   :  { %14 = vsyncpa [#allocation3 + $0x1], 0  ;;  %s1469_s24 = smov 0   ;;  %s1471_s25 = smov 0  }
   0x2   :  { %s1473_s26 = smov 0   ;;  %s1475_s27 = smov 0  }
   0x3 LB: > { %s1488_s28 = sadd.s32 4294967295, %s1424_s27   ;;  %s1491_s29 = sadd.s32 1, %s1424_s27   ;;  %s1424_s27 = sphi %s1475_s27, %s1740_s27   ;;  %s1420_s26 = sphi %s1473_s26, %s1739_s26   ;;  %s1416_s25 = sphi %s1471_s25, %s1738_s25   ;;  %s1412_s24 = sphi %s1469_s24, %s1737_s24  }
   0x4   : > { %s24_s30 = ssub.s32 %s1424_s27, %s1491_s29  ;;  %s27_s8 = sadd.s32 1, %s1420_s26 }
   0x5   : > { %p25_p0 = scmp.eq.s32.totalorder %s24_s30, 0  ;;  %p34_p1 = scmp.ne.s32.totalorder %s1420_s26, %s1416_s25 }
   0x6   : > { %p35_p2 = scmp.eq.s32.totalorder %s1424_s27, 0  ;;  %p40_p3 = scmp.ne.s32.totalorder %s1416_s25, %s1412_s24 }
   0x7   : > { %s1501_s9 = scalar_select %p25_p0, %s1420_s26, %s27_s8  }
   0x8   : > { %p36_p4 = por %p35_p2, %p34_p1  ;;  %p41_p5 = scmp.eq.s32.totalorder %s1488_s28, 0 }
   0x9   : > { %p1327_p6 = scmp.lt.s32.totalorder %s1424_s27, 2  ;;  %s234_s11 = sand.u32 1, %s1420_s26  }
   0xa   : > { %p1505_p7 = por %p41_p5, %p40_p3  ;;  %s1119_s12 = sshll.u32 %s234_s11, 4 }
   0xb   : > { %s1183_s13 = sshll.u32 %s1424_s27, 8  ;;  %s238_s17 = scalar_lea.vmem [#allocation2], %s1119_s12 }
   0xc   : > { %s1733_s10 = scalar_select %p1505_p7, 1, 0 }
   0xd   : > { %s1514_s16 = scalar_lea.hbm %s1724_s0, %s1183_s13  ;;  %s245_s18 = sshll.u32 %s238_s17, 4  ;;  %s1516_s18 = int_to_ptr.vmem [resolvable:$true] %s245_s18 }
   0xe   : > { %p1518_p8 = pnand %p1327_p6, %p36_p4  ;;  %s1523_s20 = scalar_lea.sflag [#allocation3], %s234_s11 }
   0xf   : > { %s1362_s21 = scalar_lea.hbm %s1514_s16, 256  ;;  %s1367_s24 = scalar_lea.hbm %s1724_s0, 512 }
  0x10   : > { %p1363_p10 = scmp.ne.s32.totalorder %s1514_s16, %s1362_s21  ;;  %p1364_p11 = pneg %p1518_p8 }
  0x11   : > { %p1368_p0 = scmp.lt.s32.totalorder %s1514_s16, %s1724_s0  ;;  %p1369_p1 = scmp.lt.s32.totalorder %s1367_s24, %s1362_s21 }
  0x12   : > { %p1365_p12 = pnand %p1364_p11, %p1363_p10 }
  0x13   : > { %p1370_p2 = por %p1369_p1, %p1368_p0 }
  0x14   : > { %p1366_p13 = pneg %p1365_p12 }
  0x16   : > { %p1371_p3 = pnand %p1370_p2, %p1366_p13 }
  0x18   : > { %1374 = shalt.err (!%p1371_p3)
}
  0x19   : > { %s1375_s11 = scalar_lea.vmem %s1516_s18, 256  ;;  %s1426_s12 = smov [#allocation2]  }
  0x1a   : > { %p1376_p4 = scmp.ne.s32.totalorder %s1516_s18, %s1375_s11  ;;  %s1380_s13 = sshll.u32 %s1426_s12, 4  ;;  %s1381_s13 = int_to_ptr.vmem [resolvable:$false] %s1380_s13 }
  0x1b   : > { %s1382_s14 = scalar_lea.vmem %s1381_s13, 512  ;;  %p1383_p10 = scmp.lt.s32.totalorder %s1516_s18, %s1381_s13 }
  0x1c   : > { %p1378_p5 = pnand %p1376_p4, %p1364_p11  ;;  %p1384_p12 = scmp.lt.s32.totalorder %s1382_s14, %s1375_s11 }
  0x1e   : > { %p1379_p6 = pneg %p1378_p5  ;;  %p1385_p9 = por %p1384_p12, %p1383_p10 }
  0x20   : > { %p1386_p7 = pnand %p1385_p9, %p1379_p6 }
  0x22   : > { %1389 = shalt.err (!%p1386_p7)
}
  0x23   : > { %s1427_s15 = smov 128   ;;  %s1428_s17 = smov 8  }
  0x24   : > { %1326 = dma.hbm_to_vmem [thread:$0]  (!%p1518_p8), %s1514_s16, 256, %s1516_s18, %s1523_s20, %s1427_s15, %s1427_s15, %s1428_s17  }
  0x25   : > { %p253_p11 = scmp.lt.s32.totalorder %s1424_s27, 3  ;;  %p1735_p13 = scmp.ge.s32.totalorder %s1424_s27, 1 }
  0x27   : > { %p254_p0 = pnand %p1735_p13, %p253_p11 }
  0x28   : > { %s259_s21 = sand.u32 (!%p254_p0), 1, %s1416_s25   ;;  %p1736_p7 = scmp.ne.s32.totalorder (!%p254_p0), %s1733_s10, 0 }
  0x29   : > { %257 = sbr.rel (%p254_p0) target bundleno = 1062 (0x426), region = 48  ;;  %s1123_s22 = sshll.u32 (!%p254_p0), %s259_s21, 4 }
  0x2a   : > { %s260_s23 = scalar_lea.sflag (!%p254_p0), [#allocation3], %s259_s21  ;;  %s263_s24 = scalar_lea.vmem (!%p254_p0), [#allocation2], %s1123_s22 }
  0x2e   : > { %1407 = dma.done.wait (%p1736_p7), %s260_s23, 256  }
  0x2f   : > { %1409 = vsyncadd (%p1736_p7), %s260_s23, 4294967040  ;;  %vm312_vm0 = vcmask 261120   ;;  %v304_v0 = vld [vmem:[%s1725_s1 + $0x18] sm:$0xff]  ;;  %v303_v1 = vld [vmem:[%s1725_s1 + $0x10] sm:$0xff]  ;;  %p294_p8 = scmp.lt.s32.totalorder %s1488_s28, 1 }
  0x30   : > { %1233 = vmatprep.subr.mxu0 %v304_v0  ;;  %v1558_v2 = vld [vmem:[%s263_s24] sm:$0xff]  ;;  %v302_v3 = vld [vmem:[%s1725_s1 + $0x8] sm:$0xff]  ;;  %v401_v6 = vld [vmem:[%s1727_s3 + $0x18] sm:$0xff] }
  0x31   : > { %1234 = vmatpush3.msra.mxu0 %v304_v0  ;;  %1241 = vmatprep.mubr.msk.f32.mxu0 %vm312_vm0, %v1558_v2  ;;  %v301_v4 = vld [vmem:[%s1725_s1] sm:$0xff]  ;;  %v1568_v5 = vld [vmem:[%s263_s24 + $0x8] sm:$0xff]  ;;  %v400_v7 = vld [vmem:[%s1727_s3 + $0x10] sm:$0xff]  ;;  %s1742_s28 = smov (!%p294_p8, %s1488_s28), 1 }
  0x32   : > { %1235 = vmatprep.subr.mxu0 %v303_v1  ;;  %1244 = vmatprep.subr.mxu1 %v401_v6  ;;  %v399_v8 = vld [vmem:[%s1727_s3 + $0x8] sm:$0xff]  ;;  %v398_v9 = vld [vmem:[%s1727_s3] sm:$0xff]  ;;  %v493_v10 = vld [vmem:[%s1729_s5 + $0x18] sm:$0xff]  ;;  %s1184_s16 = sshll.u32 %s1742_s28, 6 }
  0x33   : > { %1236 = vmatpush3.msra.mxu0 %v303_v1  ;;  %1245 = vmatpush3.msra.mxu1 %v401_v6  ;;  %v1138_v11 = vld [vmem:[%s1729_s5 + $0x38] sm:$0xff]  ;;  %v492_v12 = vld [vmem:[%s1729_s5 + $0x10] sm:$0xff]  ;;  %v1126_v13 = vld [vmem:[%s1726_s2] ss:$0 sm:$0xff]  ;;  %s1665_s12 = scalar_lea.vmem %s1731_s7, %s1184_s16 }
  0x34   : > { %1237 = vmatprep.subr.mxu0 %v302_v3  ;;  %1246 = vmatprep.subr.mxu1 %v400_v7  ;;  %v1137_v22 = vld [vmem:[%s1729_s5 + $0x30] sm:$0xff]  ;;  %v491_v23 = vld [vmem:[%s1729_s5 + $0x8] sm:$0xff]  ;;  %v490_v25 = vld [vmem:[%s1729_s5] sm:$0xff] }
  0x35   : > { %1238 = vmatpush3.msra.mxu0 %v302_v3  ;;  %1247 = vmatpush3.msra.mxu1 %v400_v7  ;;  %v1136_v24 = vld [vmem:[%s1729_s5 + $0x28] sm:$0xff]  ;;  %v1135_v26 = vld [vmem:[%s1729_s5 + $0x20] sm:$0xff]  ;;  %v1148_v27 = vld [vmem:[%s1725_s1 + $0x38] sm:$0xff] }
  0x36   : > { %1239 = vmatprep.subr.mxu0 %v301_v4  ;;  %1248 = vmatprep.subr.mxu1 %v399_v8  ;;  %v1129_v29 = vld [vmem:[%s1728_s4] ss:$0 sm:$0xff]  ;;  %v1147_v33 = vld [vmem:[%s1725_s1 + $0x30] sm:$0xff]  ;;  %v1146_v34 = vld [vmem:[%s1725_s1 + $0x28] sm:$0xff] }
  0x37   : > { %1240 = vmatpush3.msra.mxu0 %v301_v4  ;;  %1249 = vmatpush3.msra.mxu1 %v399_v8  ;;  %v1145_v35 = vld [vmem:[%s1725_s1 + $0x20] sm:$0xff]  ;;  %v1156_v36 = vld [vmem:[%s1727_s3 + $0x38] sm:$0xff]  ;;  %v1155_v37 = vld [vmem:[%s1727_s3 + $0x30] sm:$0xff] }
  0x38   : > { %1242 = vmatmul.mubr.msk.f32.vlgmr.msra.gmra.mxu0 %vm312_vm0, %v1568_v5  ;;  %1250 = vmatprep.subr.mxu1 %v398_v9  ;;  %v1154_v38 = vld [vmem:[%s1727_s3 + $0x28] sm:$0xff]  ;;  %v1153_v39 = vld [vmem:[%s1727_s3 + $0x20] sm:$0xff]  ;;  %v1164_v40 = vld [vmem:[%s1729_s5 + $0x58] sm:$0xff] }
  0x39   : > { %1251 = vmatpush3.msra.mxu1 %v398_v9  ;;  %1255 = vmatprep.subr.mxu0 %v493_v10  ;;  %v1174_v41 = vld [vmem:[%s1729_s5 + $0x78] sm:$0xff]  ;;  %v1132_v42 = vld [vmem:[%s1730_s6] ss:$0 sm:$0xff]  ;;  %v1140_v43 = vld [vmem:[%s1730_s6 + $0x1] ss:$0 sm:$0xff] }
  0x3a   : > { %1266 = vmatprep.subr.mxu1 %v1138_v11  ;;  %1256 = vmatpush3.msra.mxu0 %v493_v10  ;;  %v1150_v52 = vld [vmem:[%s1726_s2 + $0x1] ss:$0 sm:$0xff]  ;;  %v1163_v61 = vld [vmem:[%s1729_s5 + $0x50] sm:$0xff]  ;;  %v1162_v63 = vld [vmem:[%s1729_s5 + $0x48] sm:$0xff] }
  0x3b   : > { %1257 = vmatprep.subr.mxu0 %v492_v12  ;;  %v1173_v62 = vld [vmem:[%s1729_s5 + $0x70] sm:$0xff]  ;;  %v1172_v0 = vld [vmem:[%s1729_s5 + $0x68] sm:$0xff]  ;;  %v1161_v1 = vld [vmem:[%s1729_s5 + $0x40] sm:$0xff] }
  0x3c   : > { %1258 = vmatpush3.msra.mxu0 %v492_v12  ;;  %v1158_v4 = vld [vmem:[%s1728_s4 + $0x1] ss:$0 sm:$0xff]  ;;  %v1166_v8 = vld [vmem:[%s1730_s6 + $0x2] ss:$0 sm:$0xff]  ;;  %v1176_v9 = vld [vmem:[%s1730_s6 + $0x3] ss:$0 sm:$0xff] }
  0x3d   : > { %1259 = vmatprep.subr.mxu0 %v491_v23 }
  0x3e   : > { %1260 = vmatpush3.msra.mxu0 %v491_v23 }
  0x3f   : > { %1261 = vmatprep.subr.mxu0 %v490_v25 }
  0x40   : > { %1262 = vmatpush3.msra.mxu0 %v490_v25 }
  0x41   : > { %1277 = vmatprep.subr.mxu0 %v1148_v27 }
  0xf8   : > { %v1243_v14 = vpop.f32.mrf.mxu0 }
  0xf9   : > { %v391_v15 = vadd.f32 %v1243_v14, %v1126_v13 }
  0xfa   : > { %v385_v16 = vpop.f32.mrf.mxu0 }
  0xfb   : > { %v386_v17 = vadd.f32 %v1126_v13, %v385_v16  ;;  %v395_v18 = vmul.f32 0.01, %v391_v15 }
  0xfd   : > { %v394_v19 = vmul.f32 0.01, %v386_v17  ;;  %v397_v21 = vmax.f32 %v391_v15, %v395_v18 }
  0xff   : > { %v396_v20 = vmax.f32 %v386_v17, %v394_v19 }
 0x101   : > { %1252 = vmatprep.mubr.msk.f32.mxu1 %vm312_vm0, %v396_v20 }
 0x102   : > { %1253 = vmatmul.mubr.msk.f32.vlgmr.msra.gmra.mxu1 %vm312_vm0, %v397_v21 }
 0x103   : > { %1267 = vmatpush3.msra.mxu1 %v1138_v11 }
 0x104   : > { %1268 = vmatprep.subr.mxu1 %v1137_v22 }
 0x105   : > { %1269 = vmatpush3.msra.mxu1 %v1137_v22 }
 0x106   : > { %1270 = vmatprep.subr.mxu1 %v1136_v24 }
 0x107   : > { %1271 = vmatpush3.msra.mxu1 %v1136_v24 }
 0x108   : > { %1272 = vmatprep.subr.mxu1 %v1135_v26 }
 0x109   : > { %1273 = vmatpush3.msra.mxu1 %v1135_v26 }
 0x10a   : > { %1288 = vmatprep.subr.mxu1 %v1156_v36 }
 0x1c2   : > { %v1254_v28 = vpop.f32.mrf.mxu1 }
 0x1c3   : > { %v487_v32 = vadd.f32 %v1254_v28, %v1129_v29 }
 0x1c4   : > { %v481_v30 = vpop.f32.mrf.mxu1 }
 0x1c5   : > { %v482_v31 = vadd.f32 %v1129_v29, %v481_v30 }
 0x1c7   : > { %1263 = vmatprep.mubr.msk.f32.mxu0 %vm312_vm0, %v482_v31  ;;  %1274 = vmatprep.mubr.msk.f32.mxu1 %vm312_vm0, %v482_v31 }
 0x1c8   : > { %1264 = vmatmul.mubr.msk.f32.vlgmr.msra.gmra.mxu0 %vm312_vm0, %v487_v32  ;;  %1275 = vmatmul.mubr.msk.f32.vlgmr.msra.gmra.mxu1 %vm312_vm0, %v487_v32 }
 0x1c9   : > { %1278 = vmatpush3.msra.mxu0 %v1148_v27  ;;  %1285 = vmatprep.mubr.msk.f32.mxu0 %vm312_vm0, %v1558_v2  ;;  %v1171_v2 = vld [vmem:[%s1729_s5 + $0x60] sm:$0xff] }
 0x1ca   : > { %1279 = vmatprep.subr.mxu0 %v1147_v33  ;;  %1289 = vmatpush3.msra.mxu1 %v1156_v36 }
 0x1cb   : > { %1280 = vmatpush3.msra.mxu0 %v1147_v33  ;;  %1290 = vmatprep.subr.mxu1 %v1155_v37 }
 0x1cc   : > { %1281 = vmatprep.subr.mxu0 %v1146_v34  ;;  %1291 = vmatpush3.msra.mxu1 %v1155_v37 }
 0x1cd   : > { %1282 = vmatpush3.msra.mxu0 %v1146_v34  ;;  %1292 = vmatprep.subr.mxu1 %v1154_v38 }
 0x1ce   : > { %1283 = vmatprep.subr.mxu0 %v1145_v35  ;;  %1293 = vmatpush3.msra.mxu1 %v1154_v38 }
 0x1cf   : > { %1284 = vmatpush3.msra.mxu0 %v1145_v35  ;;  %1294 = vmatprep.subr.mxu1 %v1153_v39 }
 0x1d0   : > { %1286 = vmatmul.mubr.msk.f32.vlgmr.msra.gmra.mxu0 %vm312_vm0, %v1568_v5  ;;  %1295 = vmatpush3.msra.mxu1 %v1153_v39 }
 0x1d1   : > { %1299 = vmatprep.subr.mxu0 %v1164_v40  ;;  %1310 = vmatprep.subr.mxu1 %v1174_v41 }
 0x1d2   : > { %1300 = vmatpush3.msra.mxu0 %v1164_v40 }
 0x1d3   : > { %1301 = vmatprep.subr.mxu0 %v1163_v61 }
 0x1d4   : > { %1302 = vmatpush3.msra.mxu0 %v1163_v61 }
 0x1d5   : > { %1303 = vmatprep.subr.mxu0 %v1162_v63 }
 0x1d6   : > { %1304 = vmatpush3.msra.mxu0 %v1162_v63 }
 0x1d7   : > { %1305 = vmatprep.subr.mxu0 %v1161_v1 }
 0x1d8   : > { %1306 = vmatpush3.msra.mxu0 %v1161_v1 }
 0x288   : > { %v1265_v44 = vpop.f32.mrf.mxu0  ;;  %v1276_v45 = vpop.f32.mrf.mxu1 }
 0x289   : > { %v579_v46 = vadd.f32 %v1265_v44, %v1132_v42  ;;  %v669_v47 = vadd.f32 %v1276_v45, %v1140_v43 }
 0x28a   : > { %v573_v48 = vpop.f32.mrf.mxu0  ;;  %v663_v49 = vpop.f32.mrf.mxu1 }
 0x28b   : > { %583 = vst [vmem:[%s1665_s12 + $0x8] sm:$0xff] %v579_v46  ;;  %1144 = vst [vmem:[%s1665_s12 + $0x18] sm:$0xff] %v669_v47  ;;  %v574_v50 = vadd.f32 %v1132_v42, %v573_v48  ;;  %v664_v51 = vadd.f32 %v1140_v43, %v663_v49 }
 0x28d   : > { %582 = vst [vmem:[%s1665_s12] sm:$0xff] %v574_v50  ;;  %1143 = vst [vmem:[%s1665_s12 + $0x10] sm:$0xff] %v664_v51 }
 0x290   : > { %v1287_v53 = vpop.f32.mrf.mxu0 }
 0x291   : > { %v760_v54 = vadd.f32 %v1287_v53, %v1150_v52 }
 0x292   : > { %v754_v55 = vpop.f32.mrf.mxu0 }
 0x293   : > { %v755_v56 = vadd.f32 %v1150_v52, %v754_v55  ;;  %v764_v57 = vmul.f32 0.01, %v760_v54 }
 0x295   : > { %v763_v58 = vmul.f32 0.01, %v755_v56  ;;  %v766_v60 = vmax.f32 %v760_v54, %v764_v57 }
 0x297   : > { %v765_v59 = vmax.f32 %v755_v56, %v763_v58 }
 0x299   : > { %1296 = vmatprep.mubr.msk.f32.mxu1 %vm312_vm0, %v765_v59 }
 0x29a   : > { %1297 = vmatmul.mubr.msk.f32.vlgmr.msra.gmra.mxu1 %vm312_vm0, %v766_v60 }
 0x29b   : > { %1311 = vmatpush3.msra.mxu1 %v1174_v41 }
 0x29c   : > { %1312 = vmatprep.subr.mxu1 %v1173_v62 }
 0x29d   : > { %1313 = vmatpush3.msra.mxu1 %v1173_v62 }
 0x29e   : > { %1314 = vmatprep.subr.mxu1 %v1172_v0 }
 0x29f   : > { %1315 = vmatpush3.msra.mxu1 %v1172_v0 }
 0x2a0   : > { %1316 = vmatprep.subr.mxu1 %v1171_v2 }
 0x2a1   : > { %1317 = vmatpush3.msra.mxu1 %v1171_v2 }
 0x35a   : > { %v1298_v3 = vpop.f32.mrf.mxu1 }
 0x35b   : > { %v858_v7 = vadd.f32 %v1298_v3, %v1158_v4 }
 0x35c   : > { %v852_v5 = vpop.f32.mrf.mxu1 }
 0x35d   : > { %v853_v6 = vadd.f32 %v1158_v4, %v852_v5 }
 0x35f   : > { %1307 = vmatprep.mubr.msk.f32.mxu0 %vm312_vm0, %v853_v6  ;;  %1318 = vmatprep.mubr.msk.f32.mxu1 %vm312_vm0, %v853_v6 }
 0x360   : > { %1308 = vmatmul.mubr.msk.f32.vlgmr.msra.gmra.mxu0 %vm312_vm0, %v858_v7  ;;  %1319 = vmatmul.mubr.msk.f32.vlgmr.msra.gmra.mxu1 %vm312_vm0, %v858_v7 }
 0x420   : > { %v1309_v10 = vpop.f32.mrf.mxu0  ;;  %v1320_v11 = vpop.f32.mrf.mxu1 }
 0x421   : > { %v952_v12 = vadd.f32 %v1309_v10, %v1166_v8  ;;  %v1043_v13 = vadd.f32 %v1320_v11, %v1176_v9 }
 0x422   : > { %v946_v14 = vpop.f32.mrf.mxu0  ;;  %v1037_v15 = vpop.f32.mrf.mxu1 }
 0x423   : > { %1170 = vst [vmem:[%s1665_s12 + $0x28] sm:$0xff] %v952_v12  ;;  %1180 = vst [vmem:[%s1665_s12 + $0x38] sm:$0xff] %v1043_v13  ;;  %v947_v16 = vadd.f32 %v1166_v8, %v946_v14  ;;  %v1038_v17 = vadd.f32 %v1176_v9, %v1037_v15 }
 0x425   : > { %1169 = vst [vmem:[%s1665_s12 + $0x20] sm:$0xff] %v947_v16  ;;  %1179 = vst [vmem:[%s1665_s12 + $0x30] sm:$0xff] %v1038_v17 }
 0x426 PF: > { %p17_p9 = scmp.ge.s32.totalorder %s1491_s29, 4   ;;  %s1737_s24 = smov %s1416_s25 }
 0x427   : > { %s1738_s25 = smov %s1420_s26  ;;  %s1739_s26 = smov %s1501_s9 }
 0x428   : > { %s1740_s27 = smov %s1491_s29  ;;  %19 = sbr.rel (!%p17_p9) target bundleno = 3 (0x3), region = 101 }
 0x42d   :  { %1070 = vsyncpa [#allocation3], 1 }
 0x42e   :  { %1072 = vsyncpa [#allocation3 + $0x1], 1 }

// kernel: nice_forward.3
= control target key start
LH: loop header
LB: loop body
LE: loop exit
PB: predicated region body
PF: predicated region fallthrough
CT: control target
= control target key end

     0   :  { %s2676_s18 = smov 0   ;;  %s2678_s19 = smov 0   ;;  %s3280_s0 = inlined_call_operand.vmem [shape: f32[2,16,8,128], index: 0, kind: input, shape index: {}]   ;;  %s3281_s1 = inlined_call_operand.vmem [shape: f32[2,16,128,4], index: 1, kind: input, shape index: {}]   ;;  %s3282_s2 = inlined_call_operand.vmem [shape: f32[4,128,8], index: 2, kind: input, shape index: {}]   ;;  %s3283_s3 = inlined_call_operand.vmem [shape: f32[4,8,128], index: 3, kind: input, shape index: {}]   ;;  %s3284_s4 = inlined_call_operand.vmem [shape: f32[4,8,1], index: 4, kind: input, shape index: {}]   ;;  %s3285_s5 = inlined_call_operand.vmem [shape: f32[2,16,8,128], index: 5, kind: output, shape index: {}]  }
   0x1   :  { %s2680_s20 = smov 0   ;;  %s2682_s21 = smov 0  }
   0x2   :  { %s2684_s22 = smov 0  }
   0x3 LB: > { %s30_s23 = sadd.s32 1, %s2630_s20  ;;  %s34_s24 = sadd.s32 1, %s2634_s21  ;;  %s2638_s22 = sphi %s2684_s22, %s15_s22   ;;  %s2634_s21 = sphi %s2682_s21, %s3289_s21   ;;  %s2630_s20 = sphi %s2680_s20, %s3288_s20   ;;  %s2626_s19 = sphi %s2678_s19, %s3287_s19   ;;  %s2622_s18 = sphi %s2676_s18, %s3286_s18  }
   0x4   : > { %p32_p0 = scmp.ge.s32.totalorder %s30_s23, 16  ;;  %p2023_p1 = scmp.ge.s32.totalorder %s2638_s22, 1 }
   0x5   : > { %p236_p2 = scmp.lt.s32.totalorder %s2638_s22, 33 }
   0x6   : > { %s3291_s23 = smov (%p32_p0, %s30_s23), 0  ;;  %s3293_s24 = smov (!%p32_p0, %s34_s24), %s2634_s21 }
   0x7   : > { %p237_p3 = pnand %p2023_p1, %p236_p2  ;;  %p36_p4 = scmp.ge.s32.totalorder %s3293_s24, 2 }
   0x8   : > { %p285_p5 = scmp.lt.s32.totalorder (!%p237_p3), %s2626_s19, 1  ;;  %p287_p6 = scmp.lt.s32.totalorder (!%p237_p3), %s2622_s18, 15 }
   0x9   : > { %s3295_s24 = smov (%p36_p4, %s3293_s24), 0  ;;  %240 = sbr.rel (%p237_p3) target bundleno = 1849 (0x739), region = 40 }
   0xe   : > { %v333_v0 = vld [vmem:[%s3282_s2] sm:$0xff]  ;;  %vm429_vm0 = vcmask 64512   ;;  %s3297_s19 = smov (!%p285_p5, %s2626_s19), 1  ;;  %v2640_v1 = vmov 0   ;;  %s3299_s18 = smov (!%p287_p6, %s2622_s18), 15  ;;  %v334_v3 = vld [vmem:[%s3282_s2 + $0x8] sm:$0xff] }
   0xf   : > { %2289 = vmatprep.mubr.msk.f32.mxu0 %vm429_vm0, %v333_v0  ;;  %2577 = vset.pattern.permute.xlu0 %v2640_v1  ;;  %s2024_s27 = sshll.u32 %s3297_s19, 4  ;;  %s2027_s28 = sshll.u32 %s3297_s19, 8  ;;  %v335_v4 = vld [vmem:[%s3282_s2 + $0x10] sm:$0xff]  ;;  %v336_v8 = vld [vmem:[%s3282_s2 + $0x18] sm:$0xff]  ;;  %v337_v10 = vld [vmem:[%s3282_s2 + $0x20] sm:$0xff]  ;;  %v2641_v35 = vmov 0.0  }
  0x10   : > { %2578 = vset.pattern.permute.xlu1 %v2640_v1  ;;  %s2712_s29 = sadd.s32 %s2024_s27, %s3299_s18  ;;  %s2026_s30 = sshll.u32 %s3299_s18, 4  ;;  %v338_v12 = vld [vmem:[%s3282_s2 + $0x28] sm:$0xff]  ;;  %v339_v14 = vld [vmem:[%s3282_s2 + $0x30] sm:$0xff]  ;;  %v340_v16 = vld [vmem:[%s3282_s2 + $0x38] sm:$0xff]  ;;  %2313 = vmatprep.subr.mxu1 %v2641_v35  ;;  %vm2642_vm1 = vmmov 0  }
  0x11   : > { %s2025_s6 = sshll.u32 %s2712_s29, 3  ;;  %s302_s7 = sadd.s32 %s2027_s28, %s2026_s30  ;;  %v341_v18 = vld [vmem:[%s3282_s2 + $0x40] sm:$0xff]  ;;  %v342_v20 = vld [vmem:[%s3282_s2 + $0x48] sm:$0xff]  ;;  %v343_v22 = vld [vmem:[%s3282_s2 + $0x50] sm:$0xff]  ;;  %2345 = vmatprep.mubr.msk.f32.mxu1 %vm2642_vm1, %v2641_v35 }
  0x12   : > { %s295_s10 = scalar_lea.vmem %s3280_s0, %s2025_s6  ;;  %s2028_s11 = sshll.u32 %s302_s7, 3  ;;  %v344_v24 = vld [vmem:[%s3282_s2 + $0x58] sm:$0xff]  ;;  %v345_v26 = vld [vmem:[%s3282_s2 + $0x60] sm:$0xff]  ;;  %v346_v28 = vld [vmem:[%s3282_s2 + $0x68] sm:$0xff] }
  0x13   : > { %s2723_s14 = scalar_lea.vmem %s3281_s1, %s2028_s11  ;;  %v2725_v2 = vld [vmem:[%s295_s10] sm:$0xff]  ;;  %v347_v30 = vld [vmem:[%s3282_s2 + $0x70] sm:$0xff]  ;;  %v348_v32 = vld [vmem:[%s3282_s2 + $0x78] sm:$0xff] }
  0x14   : > { %2287 = vmatprep.subr.mxu0 %v2725_v2  ;;  %v2735_v5 = vld [vmem:[%s2723_s14 + $0x78] sm:$0xff]  ;;  %v2738_v6 = vld [vmem:[%s2723_s14 + $0x68] sm:$0xff]  ;;  %v2745_v7 = vld [vmem:[%s2723_s14 + $0x70] sm:$0xff] }
  0x15   : > { %2288 = vmatpush3.msra.mxu0 %v2725_v2  ;;  %426 = vperm.xlu0 %2577, %v2735_v5   ;;  %v2752_v9 = vld [vmem:[%s2723_s14 + $0x60] sm:$0xff]  ;;  %v2761_v11 = vld [vmem:[%s2723_s14 + $0x58] sm:$0xff]  ;;  %v2768_v13 = vld [vmem:[%s2723_s14 + $0x50] sm:$0xff] }
  0x16   : > { %2290 = vmatmul.mubr.msk.f32.vlgmr.msra.gmra.mxu0 %vm429_vm0, %v334_v3  ;;  %416 = vperm.xlu1 %2578, %v2738_v6   ;;  %v2777_v15 = vld [vmem:[%s2723_s14 + $0x48] sm:$0xff]  ;;  %v2784_v17 = vld [vmem:[%s2723_s14 + $0x40] sm:$0xff]  ;;  %v2793_v19 = vld [vmem:[%s2723_s14 + $0x38] sm:$0xff] }
  0x17   : > { %2292 = vmatprep.mubr.msk.f32.mxu0 %vm429_vm0, %v335_v4  ;;  %v2800_v21 = vld [vmem:[%s2723_s14 + $0x30] sm:$0xff]  ;;  %v2809_v23 = vld [vmem:[%s2723_s14 + $0x28] sm:$0xff]  ;;  %v2816_v25 = vld [vmem:[%s2723_s14 + $0x20] sm:$0xff] }
  0x18   : > { %v2825_v27 = vld [vmem:[%s2723_s14 + $0x18] sm:$0xff]  ;;  %v2832_v29 = vld [vmem:[%s2723_s14 + $0x10] sm:$0xff]  ;;  %v2841_v31 = vld [vmem:[%s2723_s14 + $0x8] sm:$0xff] }
  0x19   : > { %421 = vperm.xlu0 %2577, %v2745_v7   ;;  %v2848_v33 = vld [vmem:[%s2723_s14] sm:$0xff] }
  0x1a   : > { %2293 = vmatmul.mubr.msk.f32.gmra.mxu0 %vm429_vm0, %v336_v8  ;;  %411 = vperm.xlu1 %2578, %v2752_v9   ;;  %v727_v34 = vld [vmem:[%s3284_s4] sm:$0xff] }
  0x1b   : > { %2295 = vmatprep.mubr.msk.f32.mxu0 %vm429_vm0, %v337_v10 }
  0x1d   : > { %406 = vperm.xlu0 %2577, %v2761_v11  }
  0x1e   : > { %2296 = vmatmul.mubr.msk.f32.gmra.mxu0 %vm429_vm0, %v338_v12  ;;  %401 = vperm.xlu1 %2578, %v2768_v13  }
  0x1f   : > { %2298 = vmatprep.mubr.msk.f32.mxu0 %vm429_vm0, %v339_v14 }
  0x21   : > { %396 = vperm.xlu0 %2577, %v2777_v15  }
  0x22   : > { %2299 = vmatmul.mubr.msk.f32.gmra.mxu0 %vm429_vm0, %v340_v16  ;;  %391 = vperm.xlu1 %2578, %v2784_v17  }
  0x23   : > { %2301 = vmatprep.mubr.msk.f32.mxu0 %vm429_vm0, %v341_v18 }
  0x25   : > { %386 = vperm.xlu0 %2577, %v2793_v19  }
  0x26   : > { %2302 = vmatmul.mubr.msk.f32.gmra.mxu0 %vm429_vm0, %v342_v20  ;;  %381 = vperm.xlu1 %2578, %v2800_v21  }
  0x27   : > { %2304 = vmatprep.mubr.msk.f32.mxu0 %vm429_vm0, %v343_v22 }
  0x29   : > { %376 = vperm.xlu0 %2577, %v2809_v23  }
  0x2a   : > { %2305 = vmatmul.mubr.msk.f32.gmra.mxu0 %vm429_vm0, %v344_v24  ;;  %371 = vperm.xlu1 %2578, %v2816_v25  }
  0x2b   : > { %2307 = vmatprep.mubr.msk.f32.mxu0 %vm429_vm0, %v345_v26 }
  0x2d   : > { %366 = vperm.xlu0 %2577, %v2825_v27  }
  0x2e   : > { %2308 = vmatmul.mubr.msk.f32.gmra.mxu0 %vm429_vm0, %v346_v28  ;;  %361 = vperm.xlu1 %2578, %v2832_v29  }
  0x2f   : > { %2310 = vmatprep.mubr.msk.f32.mxu0 %vm429_vm0, %v347_v30 }
  0x31   : > { %356 = vperm.xlu0 %2577, %v2841_v31  }
  0x32   : > { %2311 = vmatmul.mubr.msk.f32.gmra.mxu0 %vm429_vm0, %v348_v32  ;;  %351 = vperm.xlu1 %2578, %v2848_v33  }
  0x35   : > { %730 = vperm.xlu0 %2577, %v727_v34  }
  0x90   : > { %v427_v40 = vpop.permute.xlu0 %426 }
  0x91   : > { %v417_v42 = vpop.permute.xlu1 %416 }
  0x94   : > { %v422_v45 = vpop.permute.xlu0 %421 }
  0x95   : > { %v412_v47 = vpop.permute.xlu1 %411 }
  0x98   : > { %v407_v50 = vpop.permute.xlu0 %406 }
  0x99   : > { %v402_v52 = vpop.permute.xlu1 %401 }
  0x9c   : > { %v397_v55 = vpop.permute.xlu0 %396 }
  0x9d   : > { %v392_v57 = vpop.permute.xlu1 %391 }
  0xa0   : > { %v387_v3 = vpop.permute.xlu0 %386 }
  0xa1   : > { %v382_v14 = vpop.permute.xlu1 %381 }
  0xa4   : > { %v377_v28 = vpop.permute.xlu0 %376 }
  0xd6   : > { %v2859_v36 = vpop.f32.mrf.mxu0 }
  0xd8   : > { %v2861_v37 = vpop.f32.mrf.mxu0 }
  0xda   : > { %v2863_v38 = vpop.f32.mrf.mxu0 }
  0xdc   : > { %v2865_v39 = vpop.f32.mrf.mxu0 }
  0xde   : > { %v2297_v41 = vpop.f32.mrf.mxu0 }
  0xe0   : > { %v564_v43 = vpop.f32.mrf.mxu0 }
  0xe2   : > { %v2300_v44 = vpop.f32.mrf.mxu0 }
  0xe4   : > { %v574_v46 = vpop.f32.mrf.mxu0 }
  0xe6   : > { %v2303_v48 = vpop.f32.mrf.mxu0 }
  0xe7   : > { %v590_v22 = vadd.f32 %v2303_v48, %v397_v55  ;;  %v575_v48 = vadd.f32 %v574_v46, %v382_v14 }
  0xe8   : > { %v584_v49 = vpop.f32.mrf.mxu0 }
  0xe9   : > { %v585_v30 = vadd.f32 %v584_v49, %v392_v57  ;;  %v570_v49 = vadd.f32 %v2297_v41, %v377_v28 }
  0xea   : > { %v2306_v51 = vpop.f32.mrf.mxu0 }
  0xeb   : > { %v600_v4 = vadd.f32 %v2306_v51, %v407_v50  ;;  %v631_v50 = vmul.f32 0.01, %v585_v30 }
  0xec   : > { %v594_v53 = vpop.f32.mrf.mxu0 }
  0xed   : > { %v595_v16 = vadd.f32 %v594_v53, %v402_v52  ;;  %v634_v24 = vmul.f32 0.01, %v600_v4  ;;  %v367_v52 = vpop.permute.xlu0 %366  ;;  %v647_v57 = vmax.f32 %v585_v30, %v631_v50  ;;  %v2056_v50 = vld [vmem:[%s3282_s2 + $0xc8] sm:$0xff] }
  0xee   : > { %v2309_v54 = vpop.f32.mrf.mxu0  ;;  %v560_v46 = vadd.f32 %v2863_v38, %v367_v52  ;;  %v2058_v52 = vld [vmem:[%s3282_s2 + $0xd8] sm:$0xff] }
  0xef   : > { %v610_v59 = vadd.f32 %v2309_v54, %v417_v42  ;;  %v633_v32 = vmul.f32 0.01, %v595_v16  ;;  %v580_v42 = vadd.f32 %v2300_v44, %v387_v3 }
  0xf0   : > { %v604_v56 = vpop.f32.mrf.mxu0 }
  0xf1   : > { %v605_v62 = vadd.f32 %v604_v56, %v412_v47  ;;  %v636_v8 = vmul.f32 0.01, %v610_v59  ;;  %v650_v47 = vmax.f32 %v600_v4, %v634_v24  ;;  %v649_v51 = vmax.f32 %v595_v16, %v633_v32  ;;  %v655_v16 = vld [vmem:[%s3283_s3] sm:$0xff]  ;;  %v2048_v32 = vld [vmem:[%s3282_s2 + $0x88] sm:$0xff] }
  0xf2   : > { %v2312_v58 = vpop.f32.mrf.mxu0  ;;  %v630_v53 = vmul.f32 0.01, %v580_v42  ;;  %v629_v56 = vmul.f32 0.01, %v575_v48 }
  0xf3   : > { %v620_v60 = vadd.f32 %v2312_v58, %v427_v40  ;;  %v635_v18 = vmul.f32 0.01, %v605_v62  ;;  %v652_v26 = vmax.f32 %v610_v59, %v636_v8  ;;  %v372_v40 = vpop.permute.xlu1 %371  ;;  %v628_v58 = vmul.f32 0.01, %v570_v49 }
  0xf4   : > { %v614_v61 = vpop.f32.mrf.mxu0  ;;  %v565_v44 = vadd.f32 %v564_v43, %v372_v40  ;;  %v646_v59 = vmax.f32 %v580_v42, %v630_v53  ;;  %v2051_v40 = vld [vmem:[%s3282_s2 + $0xa0] sm:$0xff]  ;;  %v2052_v42 = vld [vmem:[%s3282_s2 + $0xa8] sm:$0xff] }
  0xf5   : > { %v638_v63 = vmul.f32 0.01, %v620_v60  ;;  %v615_v0 = vadd.f32 %v614_v61, %v422_v45  ;;  %v651_v34 = vmax.f32 %v605_v62, %v635_v18  ;;  %v632_v45 = vmul.f32 0.01, %v590_v22  ;;  %v2047_v18 = vld [vmem:[%s3282_s2 + $0x80] sm:$0xff]  ;;  %v2060_v53 = vld [vmem:[%s3282_s2 + $0xe8] sm:$0xff] }
  0xf6   : > { %v627_v61 = vmul.f32 0.01, %v565_v44  ;;  %v645_v62 = vmax.f32 %v575_v48, %v629_v56  ;;  %v644_v3 = vmax.f32 %v570_v49, %v628_v58  ;;  %2350 = vmatprep.mubr.msk.f32.mxu0 %vm429_vm0, %v2047_v18  ;;  %v2055_v48 = vld [vmem:[%s3282_s2 + $0xc0] sm:$0xff] }
  0xf7   : > { %v637_v10 = vmul.f32 0.01, %v615_v0  ;;  %v654_v12 = vmax.f32 %v620_v60, %v638_v63  ;;  %v648_v54 = vmax.f32 %v590_v22, %v632_v45  ;;  %v362_v55 = vpop.permute.xlu1 %361  ;;  %v357_v60 = vpop.permute.xlu0 %356  ;;  %v2053_v45 = vld [vmem:[%s3282_s2 + $0xb0] sm:$0xff]  ;;  %v2059_v49 = vld [vmem:[%s3282_s2 + $0xe0] sm:$0xff] }
  0xf8   : > { %v555_v41 = vadd.f32 %v2865_v39, %v362_v55  ;;  %v550_v43 = vadd.f32 %v2859_v36, %v357_v60  ;;  %v643_v8 = vmax.f32 %v565_v44, %v627_v61  ;;  %v2062_v55 = vld [vmem:[%s3282_s2 + $0xf8] sm:$0xff]  ;;  %v2080_v44 = vld [vmem:[%s3284_s4 + $0x8] sm:$0xff] }
  0xf9   : > { %v653_v20 = vmax.f32 %v615_v0, %v637_v10  ;;  %2314 = vmatpush3.msra.mxu1 %v654_v12  ;;  %v626_v0 = vmul.f32 0.01, %v560_v46 }
  0xfa   : > { %2315 = vmatprep.subr.mxu1 %v2641_v35  ;;  %v625_v4 = vmul.f32 0.01, %v555_v41  ;;  %v624_v39 = vmul.f32 0.01, %v550_v43 }
  0xfb   : > { %2316 = vmatpush3.msra.mxu1 %v653_v20  ;;  %v352_v63 = vpop.permute.xlu1 %351  ;;  %v642_v10 = vmax.f32 %v560_v46, %v626_v0  ;;  %v2643_v20 = vmov 1  }
  0xfc   : > { %2317 = vmatprep.subr.mxu1 %v2641_v35  ;;  %v545_v38 = vadd.f32 %v2861_v37, %v352_v63  ;;  %v641_v14 = vmax.f32 %v555_v41, %v625_v4  ;;  %v640_v36 = vmax.f32 %v550_v43, %v624_v39  ;;  %2579 = vset.pattern.permute.xlu1 %v2643_v20 }
  0xfd   : > { %2318 = vmatpush3.msra.mxu1 %v652_v26  ;;  %2580 = vset.pattern.permute.xlu0 %v2643_v20  ;;  %v731_v26 = vpop.permute.xlu0 %730 }
  0xfe   : > { %2319 = vmatprep.subr.mxu1 %v2641_v35  ;;  %v623_v12 = vmul.f32 0.01, %v545_v38  ;;  %812 = vperm.xlu1 %2579, %v2735_v5  }
  0xff   : > { %2320 = vmatpush3.msra.mxu1 %v651_v34  ;;  %808 = vperm.xlu0 %2580, %v2745_v7   ;;  %v2049_v34 = vld [vmem:[%s3282_s2 + $0x90] sm:$0xff] }
 0x100   : > { %2321 = vmatprep.subr.mxu1 %v2641_v35  ;;  %v639_v37 = vmax.f32 %v545_v38, %v623_v12 }
 0x101   : > { %2322 = vmatpush3.msra.mxu1 %v650_v47  ;;  %v2054_v47 = vld [vmem:[%s3282_s2 + $0xb8] sm:$0xff] }
 0x102   : > { %2323 = vmatprep.subr.mxu1 %v2641_v35  ;;  %804 = vperm.xlu1 %2579, %v2738_v6  }
 0x103   : > { %2324 = vmatpush3.msra.mxu1 %v649_v51  ;;  %796 = vperm.xlu0 %2580, %v2761_v11   ;;  %v2057_v51 = vld [vmem:[%s3282_s2 + $0xd0] sm:$0xff] }
 0x104   : > { %2325 = vmatprep.subr.mxu1 %v2641_v35 }
 0x105   : > { %2326 = vmatpush3.msra.mxu1 %v648_v54  ;;  %v2061_v54 = vld [vmem:[%s3282_s2 + $0xf0] sm:$0xff] }
 0x106   : > { %2327 = vmatprep.subr.mxu1 %v2641_v35  ;;  %800 = vperm.xlu1 %2579, %v2752_v9  }
 0x107   : > { %2328 = vmatpush3.msra.mxu1 %v647_v57  ;;  %788 = vperm.xlu0 %2580, %v2777_v15  }
 0x108   : > { %2329 = vmatprep.subr.mxu1 %v2641_v35 }
 0x109   : > { %2330 = vmatpush3.msra.mxu1 %v646_v59 }
 0x10a   : > { %2331 = vmatprep.subr.mxu1 %v2641_v35  ;;  %792 = vperm.xlu1 %2579, %v2768_v13  }
 0x10b   : > { %2332 = vmatpush3.msra.mxu1 %v645_v62  ;;  %780 = vperm.xlu0 %2580, %v2793_v19  }
 0x10c   : > { %2333 = vmatprep.subr.mxu1 %v2641_v35 }
 0x10d   : > { %2334 = vmatpush3.msra.mxu1 %v644_v3 }
 0x10e   : > { %2335 = vmatprep.subr.mxu1 %v2641_v35  ;;  %784 = vperm.xlu1 %2579, %v2784_v17  }
 0x10f   : > { %2336 = vmatpush3.msra.mxu1 %v643_v8  ;;  %772 = vperm.xlu0 %2580, %v2809_v23  }
 0x110   : > { %2337 = vmatprep.subr.mxu1 %v2641_v35 }
 0x111   : > { %2338 = vmatpush3.msra.mxu1 %v642_v10 }
 0x112   : > { %2339 = vmatprep.subr.mxu1 %v2641_v35  ;;  %776 = vperm.xlu1 %2579, %v2800_v21  }
 0x113   : > { %2340 = vmatpush3.msra.mxu1 %v641_v14  ;;  %764 = vperm.xlu0 %2580, %v2825_v27  }
 0x114   : > { %2341 = vmatprep.subr.mxu1 %v2641_v35 }
 0x115   : > { %2342 = vmatpush3.msra.mxu1 %v640_v36 }
 0x116   : > { %2343 = vmatprep.subr.mxu1 %v2641_v35  ;;  %768 = vperm.xlu1 %2579, %v2816_v25  }
 0x117   : > { %2344 = vmatpush3.msra.mxu1 %v639_v37  ;;  %756 = vperm.xlu0 %2580, %v2841_v31  }
 0x118   : > { %2346 = vmatmul.mubr.f32.vlgmr.msra.gmra.mxu1 %v655_v16  ;;  %2374 = vmatprep.subr.mxu1 %v2641_v35 }
 0x119   : > { %2406 = vmatprep.mubr.msk.f32.mxu1 %vm2642_vm1, %v2641_v35 }
 0x11a   : > { %760 = vperm.xlu1 %2579, %v2832_v29  }
 0x11b   : > { %2581 = vset.pattern.permute.xlu0 %v2640_v1 }
 0x11c   : > { %1117 = vperm.xlu0 %2581, %v2080_v44  }
 0x11e   : > { %752 = vperm.xlu1 %2579, %v2848_v33  }
 0x179   : > { %v813_v46 = vpop.permute.xlu1 %812 }
 0x17a   : > { %v809_v63 = vpop.permute.xlu0 %808 }
 0x17d   : > { %v805_v41 = vpop.permute.xlu1 %804 }
 0x17e   : > { %v797_v4 = vpop.permute.xlu0 %796 }
 0x181   : > { %v801_v0 = vpop.permute.xlu1 %800 }
 0x182   : > { %v789_v14 = vpop.permute.xlu0 %788 }
 0x185   : > { %v793_v39 = vpop.permute.xlu1 %792 }
 0x189   : > { %v785_v37 = vpop.permute.xlu1 %784 }
 0x1d8   : > { %v722_v22 = vpop.f32.mrf.mxu1 }
 0x1d9   : > { %v726_v24 = vsub.f32 %v2725_v2, %v722_v22  ;;  %v2050_v2 = vld [vmem:[%s3282_s2 + $0x98] sm:$0xff] }
 0x1da   : > { %v2347_v28 = vpop.f32.mrf.mxu1 }
 0x1db   : > { %v2914_v30 = vsub.f32 %v726_v24, %v731_v26 }
 0x1dd   : > { %2348 = vmatprep.subr.mxu0 %v2914_v30 }
 0x1de   : > { %2349 = vmatpush3.msra.mxu0 %v2914_v30 }
 0x1df   : > { %2351 = vmatmul.mubr.msk.f32.vlgmr.msra.gmra.mxu0 %vm429_vm0, %v2048_v32  ;;  %v781_v32 = vpop.permute.xlu0 %780 }
 0x1e0   : > { %2353 = vmatprep.mubr.msk.f32.mxu0 %vm429_vm0, %v2049_v34 }
 0x1e3   : > { %2354 = vmatmul.mubr.msk.f32.gmra.mxu0 %vm429_vm0, %v2050_v2 }
 0x1e4   : > { %2356 = vmatprep.mubr.msk.f32.mxu0 %vm429_vm0, %v2051_v40 }
 0x1e7   : > { %2357 = vmatmul.mubr.msk.f32.gmra.mxu0 %vm429_vm0, %v2052_v42 }
 0x1e8   : > { %2359 = vmatprep.mubr.msk.f32.mxu0 %vm429_vm0, %v2053_v45  ;;  %v777_v45 = vpop.permute.xlu1 %776 }
 0x1eb   : > { %2360 = vmatmul.mubr.msk.f32.gmra.mxu0 %vm429_vm0, %v2054_v47 }
 0x1ec   : > { %2362 = vmatprep.mubr.msk.f32.mxu0 %vm429_vm0, %v2055_v48 }
 0x1ef   : > { %2363 = vmatmul.mubr.msk.f32.gmra.mxu0 %vm429_vm0, %v2056_v50 }
 0x1f0   : > { %2365 = vmatprep.mubr.msk.f32.mxu0 %vm429_vm0, %v2057_v51 }
 0x1f3   : > { %2366 = vmatmul.mubr.msk.f32.gmra.mxu0 %vm429_vm0, %v2058_v52 }
 0x1f4   : > { %2368 = vmatprep.mubr.msk.f32.mxu0 %vm429_vm0, %v2059_v49 }
 0x1f7   : > { %2369 = vmatmul.mubr.msk.f32.gmra.mxu0 %vm429_vm0, %v2060_v53  ;;  %v773_v53 = vpop.permute.xlu0 %772 }
 0x1f8   : > { %2371 = vmatprep.mubr.msk.f32.mxu0 %vm429_vm0, %v2061_v54 }
 0x1fb   : > { %2372 = vmatmul.mubr.msk.f32.gmra.mxu0 %vm429_vm0, %v2062_v55 }
 0x29f   : > { %v2981_v56 = vpop.f32.mrf.mxu0 }
 0x2a1   : > { %v2983_v57 = vpop.f32.mrf.mxu0 }
 0x2a3   : > { %v2985_v58 = vpop.f32.mrf.mxu0 }
 0x2a5   : > { %v2987_v59 = vpop.f32.mrf.mxu0 }
 0x2a7   : > { %v2358_v60 = vpop.f32.mrf.mxu0 }
 0x2a9   : > { %v949_v61 = vpop.f32.mrf.mxu0 }
 0x2ab   : > { %v2361_v62 = vpop.f32.mrf.mxu0 }
 0x2ad   : > { %v959_v43 = vpop.f32.mrf.mxu0 }
 0x2af   : > { %v2364_v3 = vpop.f32.mrf.mxu0 }
 0x2b0   : > { %v975_v51 = vadd.f32 %v2364_v3, %v789_v14  ;;  %v960_v3 = vadd.f32 %v959_v43, %v777_v45 }
 0x2b1   : > { %v969_v38 = vpop.f32.mrf.mxu0 }
 0x2b2   : > { %v970_v54 = vadd.f32 %v969_v38, %v785_v37  ;;  %v955_v38 = vadd.f32 %v2358_v60, %v773_v53  ;;  %v2092_v53 = vld [vmem:[%s3282_s2 + $0x158] sm:$0xff] }
 0x2b3   : > { %v2367_v8 = vpop.f32.mrf.mxu0 }
 0x2b4   : > { %v985_v34 = vadd.f32 %v2367_v8, %v797_v4  ;;  %v1016_v4 = vmul.f32 0.01, %v970_v54 }
 0x2b5   : > { %v979_v10 = vpop.f32.mrf.mxu0 }
 0x2b6   : > { %v980_v47 = vadd.f32 %v979_v10, %v793_v39  ;;  %v1019_v52 = vmul.f32 0.01, %v985_v34  ;;  %v765_v39 = vpop.permute.xlu0 %764  ;;  %v1032_v37 = vmax.f32 %v970_v54, %v1016_v4  ;;  %v2093_v54 = vld [vmem:[%s3282_s2 + $0x160] sm:$0xff] }
 0x2b7   : > { %v2370_v12 = vpop.f32.mrf.mxu0  ;;  %v945_v43 = vadd.f32 %v2985_v58, %v765_v39 }
 0x2b8   : > { %v995_v18 = vadd.f32 %v2370_v12, %v805_v41  ;;  %v1018_v55 = vmul.f32 0.01, %v980_v47  ;;  %v965_v41 = vadd.f32 %v2361_v62, %v781_v32 }
 0x2b9   : > { %v989_v36 = vpop.f32.mrf.mxu0 }
 0x2ba   : > { %v990_v24 = vadd.f32 %v989_v36, %v801_v0  ;;  %v1021_v2 = vmul.f32 0.01, %v995_v18  ;;  %v1035_v0 = vmax.f32 %v985_v34, %v1019_v52  ;;  %v1034_v8 = vmax.f32 %v980_v47, %v1018_v55  ;;  %v2079_v47 = vld [vmem:[%s3283_s3 + $0x8] sm:$0xff] }
 0x2bb   : > { %v2373_v16 = vpop.f32.mrf.mxu0  ;;  %v1015_v10 = vmul.f32 0.01, %v965_v41  ;;  %v1014_v36 = vmul.f32 0.01, %v960_v3  ;;  %v2090_v52 = vld [vmem:[%s3282_s2 + $0x148] sm:$0xff] }
 0x2bc   : > { %v1005_v20 = vadd.f32 %v2373_v16, %v813_v46  ;;  %v1020_v48 = vmul.f32 0.01, %v990_v24  ;;  %v1037_v49 = vmax.f32 %v995_v18, %v1021_v2  ;;  %v769_v46 = vpop.permute.xlu1 %768  ;;  %v1013_v16 = vmul.f32 0.01, %v955_v38  ;;  %v2094_v55 = vld [vmem:[%s3282_s2 + $0x168] sm:$0xff] }
 0x2bd   : > { %v999_v22 = vpop.f32.mrf.mxu0  ;;  %v950_v62 = vadd.f32 %v949_v61, %v769_v46  ;;  %v1031_v18 = vmax.f32 %v965_v41, %v1015_v10  ;;  %v2096_v46 = vld [vmem:[%s3282_s2 + $0x178] sm:$0xff]  ;;  %v2114_v41 = vld [vmem:[%s3284_s4 + $0x10] sm:$0xff] }
 0x2be   : > { %v1023_v26 = vmul.f32 0.01, %v1005_v20  ;;  %v1000_v28 = vadd.f32 %v999_v22, %v809_v63  ;;  %v1036_v44 = vmax.f32 %v990_v24, %v1020_v48  ;;  %v1017_v63 = vmul.f32 0.01, %v975_v51  ;;  %v2081_v48 = vld [vmem:[%s3282_s2 + $0x100] sm:$0xff] }
 0x2bf   : > { %v1012_v22 = vmul.f32 0.01, %v950_v62  ;;  %v1030_v24 = vmax.f32 %v960_v3, %v1014_v36  ;;  %v1029_v32 = vmax.f32 %v955_v38, %v1013_v16  ;;  %2411 = vmatprep.mubr.msk.f32.mxu0 %vm429_vm0, %v2081_v48 }
 0x2c0   : > { %v1039_v40 = vmax.f32 %v1005_v20, %v1023_v26  ;;  %v1022_v42 = vmul.f32 0.01, %v1000_v28  ;;  %v1033_v12 = vmax.f32 %v975_v51, %v1017_v63  ;;  %v761_v14 = vpop.permute.xlu1 %760  ;;  %v757_v20 = vpop.permute.xlu0 %756  ;;  %v2089_v51 = vld [vmem:[%s3282_s2 + $0x140] sm:$0xff] }
 0x2c1   : > { %v940_v60 = vadd.f32 %v2987_v59, %v761_v14  ;;  %v935_v61 = vadd.f32 %v2981_v56, %v757_v20  ;;  %v1028_v2 = vmax.f32 %v950_v62, %v1012_v22 }
 0x2c2   : > { %v1038_v50 = vmax.f32 %v1000_v28, %v1022_v42  ;;  %2375 = vmatpush3.msra.mxu1 %v1039_v40  ;;  %v1011_v28 = vmul.f32 0.01, %v945_v43 }
 0x2c3   : > { %2376 = vmatprep.subr.mxu1 %v2641_v35  ;;  %v1010_v34 = vmul.f32 0.01, %v940_v60  ;;  %v1009_v59 = vmul.f32 0.01, %v935_v61 }
 0x2c4   : > { %2377 = vmatpush3.msra.mxu1 %v1038_v50  ;;  %v753_v26 = vpop.permute.xlu1 %752  ;;  %v1027_v40 = vmax.f32 %v945_v43, %v1011_v28  ;;  %v2644_v50 = vmov 2  }
 0x2c5   : > { %2378 = vmatprep.subr.mxu1 %v2641_v35  ;;  %v930_v58 = vadd.f32 %v2983_v57, %v753_v26  ;;  %v1026_v45 = vmax.f32 %v940_v60, %v1010_v34  ;;  %v1025_v56 = vmax.f32 %v935_v61, %v1009_v59  ;;  %2582 = vset.pattern.permute.xlu1 %v2644_v50 }
 0x2c6   : > { %2379 = vmatpush3.msra.mxu1 %v1037_v49  ;;  %2583 = vset.pattern.permute.xlu0 %v2644_v50  ;;  %v2091_v49 = vld [vmem:[%s3282_s2 + $0x150] sm:$0xff] }
 0x2c7   : > { %2380 = vmatprep.subr.mxu1 %v2641_v35  ;;  %v1008_v42 = vmul.f32 0.01, %v930_v58  ;;  %1199 = vperm.xlu1 %2582, %v2735_v5  }
 0x2c8   : > { %2381 = vmatpush3.msra.mxu1 %v1036_v44  ;;  %1191 = vperm.xlu0 %2583, %v2738_v6   ;;  %v1118_v6 = vpop.permute.xlu0 %1117  ;;  %v2095_v44 = vld [vmem:[%s3282_s2 + $0x170] sm:$0xff] }
 0x2c9   : > { %2382 = vmatprep.subr.mxu1 %v2641_v35  ;;  %v1024_v57 = vmax.f32 %v930_v58, %v1008_v42 }
 0x2ca   : > { %2383 = vmatpush3.msra.mxu1 %v1035_v0 }
 0x2cb   : > { %2384 = vmatprep.subr.mxu1 %v2641_v35  ;;  %1195 = vperm.xlu1 %2582, %v2745_v7  }
 0x2cc   : > { %2385 = vmatpush3.msra.mxu1 %v1034_v8  ;;  %1179 = vperm.xlu0 %2583, %v2768_v13   ;;  %v2082_v13 = vld [vmem:[%s3282_s2 + $0x108] sm:$0xff] }
 0x2cd   : > { %2386 = vmatprep.subr.mxu1 %v2641_v35 }
 0x2ce   : > { %2387 = vmatpush3.msra.mxu1 %v1033_v12 }
 0x2cf   : > { %2388 = vmatprep.subr.mxu1 %v2641_v35  ;;  %1187 = vperm.xlu1 %2582, %v2752_v9  }
 0x2d0   : > { %2389 = vmatpush3.msra.mxu1 %v1032_v37  ;;  %1171 = vperm.xlu0 %2583, %v2784_v17   ;;  %v2084_v17 = vld [vmem:[%s3282_s2 + $0x118] sm:$0xff] }
 0x2d1   : > { %2390 = vmatprep.subr.mxu1 %v2641_v35 }
 0x2d2   : > { %2391 = vmatpush3.msra.mxu1 %v1031_v18 }
 0x2d3   : > { %2392 = vmatprep.subr.mxu1 %v2641_v35  ;;  %1183 = vperm.xlu1 %2582, %v2761_v11  }
 0x2d4   : > { %2393 = vmatpush3.msra.mxu1 %v1030_v24  ;;  %1163 = vperm.xlu0 %2583, %v2800_v21   ;;  %v2086_v21 = vld [vmem:[%s3282_s2 + $0x128] sm:$0xff] }
 0x2d5   : > { %2394 = vmatprep.subr.mxu1 %v2641_v35 }
 0x2d6   : > { %2395 = vmatpush3.msra.mxu1 %v1029_v32 }
 0x2d7   : > { %2396 = vmatprep.subr.mxu1 %v2641_v35  ;;  %1175 = vperm.xlu1 %2582, %v2777_v15   ;;  %v2083_v15 = vld [vmem:[%s3282_s2 + $0x110] sm:$0xff] }
 0x2d8   : > { %2397 = vmatpush3.msra.mxu1 %v1028_v2  ;;  %1155 = vperm.xlu0 %2583, %v2816_v25  }
 0x2d9   : > { %2398 = vmatprep.subr.mxu1 %v2641_v35 }
 0x2da   : > { %2399 = vmatpush3.msra.mxu1 %v1027_v40 }
 0x2db   : > { %2400 = vmatprep.subr.mxu1 %v2641_v35  ;;  %1167 = vperm.xlu1 %2582, %v2793_v19   ;;  %v2085_v19 = vld [vmem:[%s3282_s2 + $0x120] sm:$0xff] }
 0x2dc   : > { %2401 = vmatpush3.msra.mxu1 %v1026_v45  ;;  %1147 = vperm.xlu0 %2583, %v2832_v29  }
 0x2dd   : > { %2402 = vmatprep.subr.mxu1 %v2641_v35 }
 0x2de   : > { %2403 = vmatpush3.msra.mxu1 %v1025_v56 }
 0x2df   : > { %2404 = vmatprep.subr.mxu1 %v2641_v35  ;;  %1159 = vperm.xlu1 %2582, %v2809_v23   ;;  %v2087_v23 = vld [vmem:[%s3282_s2 + $0x130] sm:$0xff] }
 0x2e0   : > { %2405 = vmatpush3.msra.mxu1 %v1024_v57  ;;  %1139 = vperm.xlu0 %2583, %v2848_v33  }
 0x2e1   : > { %2407 = vmatmul.mubr.f32.vlgmr.msra.gmra.mxu1 %v2079_v47  ;;  %2435 = vmatprep.subr.mxu1 %v2641_v35 }
 0x2e2   : > { %2467 = vmatprep.mubr.msk.f32.mxu1 %vm2642_vm1, %v2641_v35 }
 0x2e3   : > { %1151 = vperm.xlu1 %2582, %v2825_v27  }
 0x2e7   : > { %1143 = vperm.xlu1 %2582, %v2841_v31  }
 0x2eb   : > { %2584 = vset.pattern.permute.xlu1 %v2640_v1 }
 0x2ec   : > { %1504 = vperm.xlu1 %2584, %v2114_v41  }
 0x342   : > { %v1200_v0 = vpop.permute.xlu1 %1199 }
 0x343   : > { %v1192_v36 = vpop.permute.xlu0 %1191 }
 0x346   : > { %v1196_v39 = vpop.permute.xlu1 %1195 }
 0x347   : > { %v1180_v20 = vpop.permute.xlu0 %1179 }
 0x34a   : > { %v1188_v14 = vpop.permute.xlu1 %1187 }
 0x34b   : > { %v1172_v61 = vpop.permute.xlu0 %1171 }
 0x34e   : > { %v1184_v16 = vpop.permute.xlu1 %1183 }
 0x34f   : > { %v1164_v48 = vpop.permute.xlu0 %1163 }
 0x352   : > { %v1176_v24 = vpop.permute.xlu1 %1175 }
 0x356   : > { %v1168_v42 = vpop.permute.xlu1 %1167 }
 0x3a1   : > { %v1108_v5 = vpop.f32.mrf.mxu1 }
 0x3a2   : > { %v1112_v7 = vsub.f32 %v2914_v30, %v1108_v5  ;;  %v2088_v30 = vld [vmem:[%s3282_s2 + $0x138] sm:$0xff] }
 0x3a3   : > { %v2408_v9 = vpop.f32.mrf.mxu1 }
 0x3a4   : > { %v3036_v11 = vsub.f32 %v1112_v7, %v1118_v6 }
 0x3a6   : > { %2409 = vmatprep.subr.mxu0 %v3036_v11 }
 0x3a7   : > { %2410 = vmatpush3.msra.mxu0 %v3036_v11 }
 0x3a8   : > { %2412 = vmatmul.mubr.msk.f32.vlgmr.msra.gmra.mxu0 %vm429_vm0, %v2082_v13 }
 0x3a9   : > { %2414 = vmatprep.mubr.msk.f32.mxu0 %vm429_vm0, %v2083_v15  ;;  %v1160_v15 = vpop.permute.xlu1 %1159 }
 0x3ac   : > { %2415 = vmatmul.mubr.msk.f32.gmra.mxu0 %vm429_vm0, %v2084_v17 }
 0x3ad   : > { %2417 = vmatprep.mubr.msk.f32.mxu0 %vm429_vm0, %v2085_v19 }
 0x3b0   : > { %2418 = vmatmul.mubr.msk.f32.gmra.mxu0 %vm429_vm0, %v2086_v21 }
 0x3b1   : > { %2420 = vmatprep.mubr.msk.f32.mxu0 %vm429_vm0, %v2087_v23  ;;  %v1156_v23 = vpop.permute.xlu0 %1155 }
 0x3b4   : > { %2421 = vmatmul.mubr.msk.f32.gmra.mxu0 %vm429_vm0, %v2088_v30 }
 0x3b5   : > { %2423 = vmatprep.mubr.msk.f32.mxu0 %vm429_vm0, %v2089_v51 }
 0x3b8   : > { %2424 = vmatmul.mubr.msk.f32.gmra.mxu0 %vm429_vm0, %v2090_v52 }
 0x3b9   : > { %2426 = vmatprep.mubr.msk.f32.mxu0 %vm429_vm0, %v2091_v49 }
 0x3bc   : > { %2427 = vmatmul.mubr.msk.f32.gmra.mxu0 %vm429_vm0, %v2092_v53 }
 0x3bd   : > { %2429 = vmatprep.mubr.msk.f32.mxu0 %vm429_vm0, %v2093_v54 }
 0x3c0   : > { %2430 = vmatmul.mubr.msk.f32.gmra.mxu0 %vm429_vm0, %v2094_v55  ;;  %v1152_v55 = vpop.permute.xlu1 %1151 }
 0x3c1   : > { %2432 = vmatprep.mubr.msk.f32.mxu0 %vm429_vm0, %v2095_v44 }
 0x3c4   : > { %2433 = vmatmul.mubr.msk.f32.gmra.mxu0 %vm429_vm0, %v2096_v46 }
 0x468   : > { %v3103_v63 = vpop.f32.mrf.mxu0 }
 0x46a   : > { %v3105_v3 = vpop.f32.mrf.mxu0 }
 0x46c   : > { %v3107_v4 = vpop.f32.mrf.mxu0 }
 0x46e   : > { %v3109_v8 = vpop.f32.mrf.mxu0 }
 0x470   : > { %v2419_v38 = vpop.f32.mrf.mxu0 }
 0x471   : > { %v1342_v44 = vadd.f32 %v2419_v38, %v1160_v15 }
 0x472   : > { %v1336_v10 = vpop.f32.mrf.mxu0 }
 0x474   : > { %v2422_v12 = vpop.f32.mrf.mxu0 }
 0x475   : > { %v1352_v30 = vadd.f32 %v2422_v12, %v1168_v42  ;;  %v2591_v42 = vld [vmem:[%s2723_s14 + $0x60] sm:$0xff] }
 0x476   : > { %v1346_v62 = vpop.f32.mrf.mxu0 }
 0x477   : > { %v1347_v49 = vadd.f32 %v1346_v62, %v1164_v48  ;;  %v1402_v46 = vmul.f32 0.01, %v1352_v30  ;;  %v1332_v62 = vadd.f32 %v3107_v4, %v1152_v55  ;;  %v2596_v48 = vld [vmem:[%s2723_s14 + $0x48] sm:$0xff] }
 0x478   : > { %v2425_v37 = vpop.f32.mrf.mxu0 }
 0x479   : > { %v1362_v7 = vadd.f32 %v2425_v37, %v1176_v24  ;;  %v1401_v12 = vmul.f32 0.01, %v1347_v49  ;;  %v1418_v37 = vmax.f32 %v1352_v30, %v1402_v46  ;;  %v2126_v30 = vld [vmem:[%s3282_s2 + $0x1d8] sm:$0xff] }
 0x47a   : > { %v1356_v43 = vpop.f32.mrf.mxu0 }
 0x47b   : > { %v1357_v17 = vadd.f32 %v1356_v43, %v1172_v61  ;;  %v1404_v51 = vmul.f32 0.01, %v1362_v7  ;;  %v1144_v43 = vpop.permute.xlu1 %1143 }
 0x47c   : > { %v2428_v18 = vpop.f32.mrf.mxu0 }
 0x47d   : > { %v1372_v45 = vadd.f32 %v2428_v18, %v1184_v16  ;;  %v1403_v53 = vmul.f32 0.01, %v1357_v17  ;;  %v1420_v41 = vmax.f32 %v1362_v7, %v1404_v51  ;;  %v1417_v18 = vmax.f32 %v1347_v49, %v1401_v12  ;;  %v2127_v51 = vld [vmem:[%s3282_s2 + $0x1e0] sm:$0xff]  ;;  %v2129_v49 = vld [vmem:[%s3282_s2 + $0x1f0] sm:$0xff] }
 0x47e   : > { %v1366_v60 = vpop.f32.mrf.mxu0 }
 0x47f   : > { %v1367_v50 = vadd.f32 %v1366_v60, %v1180_v20  ;;  %v1406_v9 = vmul.f32 0.01, %v1372_v45  ;;  %v1398_v60 = vmul.f32 0.01, %v1332_v62 }
 0x480   : > { %v2431_v22 = vpop.f32.mrf.mxu0 }
 0x481   : > { %v1382_v32 = vadd.f32 %v2431_v22, %v1192_v36  ;;  %v1405_v19 = vmul.f32 0.01, %v1367_v50  ;;  %v1422_v52 = vmax.f32 %v1372_v45, %v1406_v9  ;;  %v1400_v36 = vmul.f32 0.01, %v1342_v44  ;;  %v2592_v45 = vld [vmem:[%s2723_s14 + $0x68] sm:$0xff]  ;;  %v1505_v9 = vpop.permute.xlu1 %1504 }
 0x482   : > { %v1376_v26 = vpop.f32.mrf.mxu0  ;;  %v1414_v61 = vmax.f32 %v1332_v62, %v1398_v60 }
 0x483   : > { %v1377_v2 = vadd.f32 %v1376_v26, %v1188_v14  ;;  %v1408_v56 = vmul.f32 0.01, %v1382_v32  ;;  %v1421_v54 = vmax.f32 %v1367_v50, %v1405_v19  ;;  %v1419_v14 = vmax.f32 %v1357_v17, %v1403_v53  ;;  %v2597_v50 = vld [vmem:[%s2723_s14 + $0x30] sm:$0xff]  ;;  %v2122_v17 = vld [vmem:[%s3282_s2 + $0x1b8] sm:$0xff]  ;;  %v2123_v19 = vld [vmem:[%s3282_s2 + $0x1c0] sm:$0xff] }
 0x484   : > { %v2434_v28 = vpop.f32.mrf.mxu0  ;;  %v1416_v22 = vmax.f32 %v1342_v44, %v1400_v36  ;;  %v2130_v53 = vld [vmem:[%s3282_s2 + $0x1f8] sm:$0xff] }
 0x485   : > { %v1392_v58 = vadd.f32 %v2434_v28, %v1200_v0  ;;  %v1407_v5 = vmul.f32 0.01, %v1377_v2  ;;  %v1424_v13 = vmax.f32 %v1382_v32, %v1408_v56  ;;  %v1148_v0 = vpop.permute.xlu0 %1147  ;;  %v2593_v56 = vld [vmem:[%s2723_s14 + $0x50] sm:$0xff] }
 0x486   : > { %v1386_v34 = vpop.f32.mrf.mxu0  ;;  %v1327_v38 = vadd.f32 %v3109_v8, %v1148_v0 }
 0x487   : > { %v1410_v59 = vmul.f32 0.01, %v1392_v58  ;;  %v1387_v40 = vadd.f32 %v1386_v34, %v1196_v39  ;;  %v1423_v21 = vmax.f32 %v1377_v2, %v1407_v5  ;;  %v1337_v39 = vadd.f32 %v1336_v10, %v1156_v23  ;;  %v2115_v34 = vld [vmem:[%s3282_s2 + $0x180] sm:$0xff]  ;;  %v2598_v5 = vld [vmem:[%s2723_s14 + $0x38] sm:$0xff]  ;;  %v2125_v23 = vld [vmem:[%s3282_s2 + $0x1d0] sm:$0xff] }
 0x488   : > { %v1322_v10 = vadd.f32 %v3103_v63, %v1144_v43  ;;  %v1397_v24 = vmul.f32 0.01, %v1327_v38  ;;  %2472 = vmatprep.mubr.msk.f32.mxu0 %vm429_vm0, %v2115_v34  ;;  %v2645_v2 = vmov 3  }
 0x489   : > { %v1426_v57 = vmax.f32 %v1392_v58, %v1410_v59  ;;  %v1409_v47 = vmul.f32 0.01, %v1387_v40  ;;  %v1399_v16 = vmul.f32 0.01, %v1337_v39  ;;  %v1140_v20 = vpop.permute.xlu0 %1139  ;;  %v2113_v58 = vld [vmem:[%s3283_s3 + $0x10] sm:$0xff]  ;;  %2585 = vset.pattern.permute.xlu0 %v2645_v2  ;;  %2586 = vset.pattern.permute.xlu1 %v2645_v2  ;;  %v2589_v59 = vld [vmem:[%s2723_s14 + $0x78] sm:$0xff] }
 0x48a   : > { %v1317_v4 = vadd.f32 %v3105_v3, %v1140_v20  ;;  %v1396_v8 = vmul.f32 0.01, %v1322_v10  ;;  %v1413_v32 = vmax.f32 %v1327_v38, %v1397_v24  ;;  %1586 = vperm.xlu0 %2585, %v2589_v59  }
 0x48b   : > { %v1425_v6 = vmax.f32 %v1387_v40, %v1409_v47  ;;  %2436 = vmatpush3.msra.mxu1 %v1426_v57  ;;  %v1415_v26 = vmax.f32 %v1337_v39, %v1399_v16  ;;  %v2590_v40 = vld [vmem:[%s2723_s14 + $0x70] sm:$0xff]  ;;  %v2594_v57 = vld [vmem:[%s2723_s14 + $0x58] sm:$0xff]  ;;  %v2595_v47 = vld [vmem:[%s2723_s14 + $0x40] sm:$0xff] }
 0x48c   : > { %2437 = vmatprep.subr.mxu1 %v2641_v35  ;;  %v1395_v28 = vmul.f32 0.01, %v1317_v4  ;;  %v1412_v63 = vmax.f32 %v1322_v10, %v1396_v8  ;;  %1582 = vperm.xlu1 %2586, %v2590_v40  }
 0x48d   : > { %2438 = vmatpush3.msra.mxu1 %v1425_v6  ;;  %v2599_v6 = vld [vmem:[%s2723_s14 + $0x28] sm:$0xff]  ;;  %s315_s14 = scalar_lea.vmem %s3285_s5, %s2025_s6 }
 0x48e   : > { %2439 = vmatprep.subr.mxu1 %v2641_v35  ;;  %v1411_v3 = vmax.f32 %v1317_v4, %v1395_v28  ;;  %1574 = vperm.xlu0 %2585, %v2591_v42  }
 0x48f   : > { %2440 = vmatpush3.msra.mxu1 %v1424_v13 }
 0x490   : > { %2441 = vmatprep.subr.mxu1 %v2641_v35  ;;  %1578 = vperm.xlu1 %2586, %v2592_v45  }
 0x491   : > { %2442 = vmatpush3.msra.mxu1 %v1423_v21  ;;  %v2124_v21 = vld [vmem:[%s3282_s2 + $0x1c8] sm:$0xff] }
 0x492   : > { %2443 = vmatprep.subr.mxu1 %v2641_v35  ;;  %1566 = vperm.xlu0 %2585, %v2593_v56  }
 0x493   : > { %2444 = vmatpush3.msra.mxu1 %v1422_v52  ;;  %v2128_v52 = vld [vmem:[%s3282_s2 + $0x1e8] sm:$0xff] }
 0x494   : > { %2445 = vmatprep.subr.mxu1 %v2641_v35  ;;  %1570 = vperm.xlu1 %2586, %v2594_v57  }
 0x495   : > { %2446 = vmatpush3.msra.mxu1 %v1421_v54  ;;  %v2148_v54 = vld [vmem:[%s3284_s4 + $0x18] sm:$0xff] }
 0x496   : > { %2447 = vmatprep.subr.mxu1 %v2641_v35  ;;  %1558 = vperm.xlu0 %2585, %v2595_v47  }
 0x497   : > { %2448 = vmatpush3.msra.mxu1 %v1420_v41 }
 0x498   : > { %2449 = vmatprep.subr.mxu1 %v2641_v35  ;;  %1562 = vperm.xlu1 %2586, %v2596_v48  }
 0x499   : > { %2450 = vmatpush3.msra.mxu1 %v1419_v14 }
 0x49a   : > { %2451 = vmatprep.subr.mxu1 %v2641_v35  ;;  %1550 = vperm.xlu0 %2585, %v2597_v50  }
 0x49b   : > { %2452 = vmatpush3.msra.mxu1 %v1418_v37 }
 0x49c   : > { %2453 = vmatprep.subr.mxu1 %v2641_v35  ;;  %1554 = vperm.xlu1 %2586, %v2598_v5  }
 0x49d   : > { %2454 = vmatpush3.msra.mxu1 %v1417_v18 }
 0x49e   : > { %2455 = vmatprep.subr.mxu1 %v2641_v35  ;;  %1542 = vperm.xlu0 %2585, %v2816_v25  }
 0x49f   : > { %2456 = vmatpush3.msra.mxu1 %v1416_v22 }
 0x4a0   : > { %2457 = vmatprep.subr.mxu1 %v2641_v35  ;;  %1546 = vperm.xlu1 %2586, %v2599_v6  }
 0x4a1   : > { %2458 = vmatpush3.msra.mxu1 %v1415_v26 }
 0x4a2   : > { %2459 = vmatprep.subr.mxu1 %v2641_v35  ;;  %1534 = vperm.xlu0 %2585, %v2832_v29   ;;  %v2116_v29 = vld [vmem:[%s3282_s2 + $0x188] sm:$0xff] }
 0x4a3   : > { %2460 = vmatpush3.msra.mxu1 %v1414_v61 }
 0x4a4   : > { %2461 = vmatprep.subr.mxu1 %v2641_v35  ;;  %1538 = vperm.xlu1 %2586, %v2825_v27   ;;  %v2117_v27 = vld [vmem:[%s3282_s2 + $0x190] sm:$0xff] }
 0x4a5   : > { %2462 = vmatpush3.msra.mxu1 %v1413_v32 }
 0x4a6   : > { %2463 = vmatprep.subr.mxu1 %v2641_v35  ;;  %1526 = vperm.xlu0 %2585, %v2848_v33   ;;  %v2120_v33 = vld [vmem:[%s3282_s2 + $0x1a8] sm:$0xff] }
 0x4a7   : > { %2464 = vmatpush3.msra.mxu1 %v1412_v63 }
 0x4a8   : > { %2465 = vmatprep.subr.mxu1 %v2641_v35  ;;  %1530 = vperm.xlu1 %2586, %v2841_v31   ;;  %v2119_v31 = vld [vmem:[%s3282_s2 + $0x1a0] sm:$0xff] }
 0x4a9   : > { %2466 = vmatpush3.msra.mxu1 %v1411_v3 }
 0x4aa   : > { %2468 = vmatmul.mubr.f32.vlgmr.msra.gmra.mxu1 %v2113_v58  ;;  %2496 = vmatprep.subr.mxu1 %v2641_v35 }
 0x4ab   : > { %2528 = vmatprep.mubr.msk.f32.mxu1 %vm2642_vm1, %v2641_v35  ;;  %2588 = vset.pattern.permute.xlu0 %v2640_v1 }
 0x4ac   : > { %2587 = vset.pattern.permute.xlu1 %v2640_v1  ;;  %v2118_v1 = vld [vmem:[%s3282_s2 + $0x198] sm:$0xff] }
 0x4ad   : > { %1891 = vperm.xlu1 %2587, %v2148_v54  }
 0x505   : > { %v1587_v12 = vpop.permute.xlu0 %1586 }
 0x507   : > { %v1583_v0 = vpop.permute.xlu1 %1582 }
 0x509   : > { %v1575_v43 = vpop.permute.xlu0 %1574 }
 0x50b   : > { %v1579_v36 = vpop.permute.xlu1 %1578 }
 0x50d   : > { %v1567_v10 = vpop.permute.xlu0 %1566 }
 0x50f   : > { %v1571_v18 = vpop.permute.xlu1 %1570 }
 0x511   : > { %v1559_v26 = vpop.permute.xlu0 %1558 }
 0x513   : > { %v1563_v4 = vpop.permute.xlu1 %1562 }
 0x515   : > { %v1551_v45 = vpop.permute.xlu0 %1550 }
 0x517   : > { %v1555_v34 = vpop.permute.xlu1 %1554 }
 0x51b   : > { %v1547_v6 = vpop.permute.xlu1 %1546 }
 0x56a   : > { %v1495_v7 = vpop.f32.mrf.mxu1 }
 0x56b   : > { %v1499_v13 = vsub.f32 %v3036_v11, %v1495_v7  ;;  %v2121_v11 = vld [vmem:[%s3282_s2 + $0x1b0] sm:$0xff] }
 0x56c   : > { %v2469_v15 = vpop.f32.mrf.mxu1 }
 0x56d   : > { %v3159_v25 = vsub.f32 %v1499_v13, %v1505_v9  ;;  %v1543_v15 = vpop.permute.xlu0 %1542 }
 0x56f   : > { %2470 = vmatprep.subr.mxu0 %v3159_v25 }
 0x570   : > { %2471 = vmatpush3.msra.mxu0 %v3159_v25 }
 0x571   : > { %2473 = vmatmul.mubr.msk.f32.vlgmr.msra.gmra.mxu0 %vm429_vm0, %v2116_v29 }
 0x572   : > { %2475 = vmatprep.mubr.msk.f32.mxu0 %vm429_vm0, %v2117_v27 }
 0x575   : > { %2476 = vmatmul.mubr.msk.f32.gmra.mxu0 %vm429_vm0, %v2118_v1 }
 0x576   : > { %2478 = vmatprep.mubr.msk.f32.mxu0 %vm429_vm0, %v2119_v31 }
 0x579   : > { %2479 = vmatmul.mubr.msk.f32.gmra.mxu0 %vm429_vm0, %v2120_v33 }
 0x57a   : > { %2481 = vmatprep.mubr.msk.f32.mxu0 %vm429_vm0, %v2121_v11 }
 0x57d   : > { %2482 = vmatmul.mubr.msk.f32.gmra.mxu0 %vm429_vm0, %v2122_v17  ;;  %v1539_v17 = vpop.permute.xlu1 %1538 }
 0x57e   : > { %2484 = vmatprep.mubr.msk.f32.mxu0 %vm429_vm0, %v2123_v19 }
 0x581   : > { %2485 = vmatmul.mubr.msk.f32.gmra.mxu0 %vm429_vm0, %v2124_v21 }
 0x582   : > { %2487 = vmatprep.mubr.msk.f32.mxu0 %vm429_vm0, %v2125_v23 }
 0x585   : > { %2488 = vmatmul.mubr.msk.f32.gmra.mxu0 %vm429_vm0, %v2126_v30  ;;  %v1535_v30 = vpop.permute.xlu0 %1534 }
 0x586   : > { %2490 = vmatprep.mubr.msk.f32.mxu0 %vm429_vm0, %v2127_v51 }
 0x589   : > { %2491 = vmatmul.mubr.msk.f32.gmra.mxu0 %vm429_vm0, %v2128_v52 }
 0x58a   : > { %2493 = vmatprep.mubr.msk.f32.mxu0 %vm429_vm0, %v2129_v49 }
 0x58d   : > { %2494 = vmatmul.mubr.msk.f32.gmra.mxu0 %vm429_vm0, %v2130_v53 }
 0x631   : > { %v3226_v55 = vpop.f32.mrf.mxu0 }
 0x633   : > { %v3228_v44 = vpop.f32.mrf.mxu0 }
 0x635   : > { %v3230_v46 = vpop.f32.mrf.mxu0 }
 0x637   : > { %v3232_v41 = vpop.f32.mrf.mxu0 }
 0x639   : > { %v2480_v39 = vpop.f32.mrf.mxu0 }
 0x63a   : > { %v1729_v23 = vadd.f32 %v2480_v39, %v1547_v6 }
 0x63b   : > { %v3234_v14 = vpop.f32.mrf.mxu0 }
 0x63c   : > { %v1724_v49 = vadd.f32 %v3234_v14, %v1543_v15  ;;  %v1787_v54 = vmul.f32 0.01, %v1729_v23 }
 0x63d   : > { %v2483_v62 = vpop.f32.mrf.mxu0 }
 0x63e   : > { %v1739_v27 = vadd.f32 %v2483_v62, %v1555_v34  ;;  %v1786_v62 = vmul.f32 0.01, %v1724_v49  ;;  %v1803_v14 = vmax.f32 %v1729_v23, %v1787_v54 }
 0x63f   : > { %v1733_v37 = vpop.f32.mrf.mxu0 }
 0x640   : > { %v1734_v31 = vadd.f32 %v1733_v37, %v1551_v45  ;;  %v1789_v21 = vmul.f32 0.01, %v1739_v27  ;;  %v1527_v37 = vpop.permute.xlu0 %1526 }
 0x641   : > { %v2486_v38 = vpop.f32.mrf.mxu0 }
 0x642   : > { %v1749_v48 = vadd.f32 %v2486_v38, %v1563_v4  ;;  %v1788_v51 = vmul.f32 0.01, %v1734_v31  ;;  %v1805_v53 = vmax.f32 %v1739_v27, %v1789_v21 }
 0x643   : > { %v1743_v16 = vpop.f32.mrf.mxu0 }
 0x644   : > { %v1744_v7 = vadd.f32 %v1743_v16, %v1559_v26  ;;  %v1791_v29 = vmul.f32 0.01, %v1749_v48  ;;  %v1804_v39 = vmax.f32 %v1734_v31, %v1788_v51 }
 0x645   : > { %v2489_v20 = vpop.f32.mrf.mxu0 }
 0x646   : > { %v1759_v2 = vadd.f32 %v2489_v20, %v1571_v18  ;;  %v1790_v33 = vmul.f32 0.01, %v1744_v7  ;;  %v1807_v19 = vmax.f32 %v1749_v48, %v1791_v29  ;;  %v1704_v18 = vadd.f32 %v3228_v44, %v1527_v37  ;;  %v2147_v44 = vld [vmem:[%s3283_s3 + $0x18] sm:$0xff] }
 0x647   : > { %v1753_v60 = vpop.f32.mrf.mxu0 }
 0x648   : > { %v1754_v56 = vadd.f32 %v1753_v60, %v1567_v10  ;;  %v1793_v50 = vmul.f32 0.01, %v1759_v2  ;;  %v1806_v52 = vmax.f32 %v1744_v7, %v1790_v33  ;;  %v1782_v60 = vmul.f32 0.01, %v1704_v18 }
 0x649   : > { %v2492_v22 = vpop.f32.mrf.mxu0 }
 0x64a   : > { %v1769_v61 = vadd.f32 %v2492_v22, %v1579_v36  ;;  %v1792_v9 = vmul.f32 0.01, %v1754_v56  ;;  %v1809_v1 = vmax.f32 %v1759_v2, %v1793_v50  ;;  %v1714_v36 = vadd.f32 %v3232_v41, %v1535_v30 }
 0x64b   : > { %v1763_v24 = vpop.f32.mrf.mxu0  ;;  %v1798_v22 = vmax.f32 %v1704_v18, %v1782_v60 }
 0x64c   : > { %v1764_v63 = vadd.f32 %v1763_v24, %v1575_v43  ;;  %v1795_v59 = vmul.f32 0.01, %v1769_v61  ;;  %v1808_v11 = vmax.f32 %v1754_v56, %v1792_v9  ;;  %v1784_v16 = vmul.f32 0.01, %v1714_v36 }
 0x64d   : > { %v2495_v8 = vpop.f32.mrf.mxu0 }
 0x64e   : > { %v1779_v28 = vadd.f32 %v2495_v8, %v1587_v12  ;;  %v1794_v57 = vmul.f32 0.01, %v1764_v63  ;;  %v1811_v5 = vmax.f32 %v1769_v61, %v1795_v59  ;;  %v1531_v12 = vpop.permute.xlu1 %1530  ;;  %v1800_v10 = vmax.f32 %v1714_v36, %v1784_v16 }
 0x64f   : > { %v1773_v32 = vpop.f32.mrf.mxu0  ;;  %v1709_v38 = vadd.f32 %v3226_v55, %v1531_v12 }
 0x650   : > { %v1797_v3 = vmul.f32 0.01, %v1779_v28  ;;  %v1774_v58 = vadd.f32 %v1773_v32, %v1583_v0  ;;  %v1810_v13 = vmax.f32 %v1764_v63, %v1794_v57  ;;  %v1719_v0 = vadd.f32 %v3230_v46, %v1539_v17 }
 0x651   : > { %v1802_v46 = vmax.f32 %v1724_v49, %v1786_v62  ;;  %v1783_v41 = vmul.f32 0.01, %v1709_v38 }
 0x652   : > { %v1813_v40 = vmax.f32 %v1779_v28, %v1797_v3  ;;  %v1796_v42 = vmul.f32 0.01, %v1774_v58  ;;  %v1785_v43 = vmul.f32 0.01, %v1719_v0  ;;  %v1892_v24 = vpop.permute.xlu1 %1891 }
 0x653   : > { %v1799_v55 = vmax.f32 %v1709_v38, %v1783_v41 }
 0x654   : > { %v1812_v47 = vmax.f32 %v1774_v58, %v1796_v42  ;;  %2497 = vmatpush3.msra.mxu1 %v1813_v40  ;;  %v1801_v20 = vmax.f32 %v1719_v0, %v1785_v43 }
 0x655   : > { %2498 = vmatprep.subr.mxu1 %v2641_v35 }
 0x656   : > { %2499 = vmatpush3.msra.mxu1 %v1812_v47 }
 0x657   : > { %2500 = vmatprep.subr.mxu1 %v2641_v35 }
 0x658   : > { %2501 = vmatpush3.msra.mxu1 %v1811_v5 }
 0x659   : > { %2502 = vmatprep.subr.mxu1 %v2641_v35 }
 0x65a   : > { %2503 = vmatpush3.msra.mxu1 %v1810_v13 }
 0x65b   : > { %2504 = vmatprep.subr.mxu1 %v2641_v35 }
 0x65c   : > { %2505 = vmatpush3.msra.mxu1 %v1809_v1 }
 0x65d   : > { %2506 = vmatprep.subr.mxu1 %v2641_v35 }
 0x65e   : > { %2507 = vmatpush3.msra.mxu1 %v1808_v11 }
 0x65f   : > { %2508 = vmatprep.subr.mxu1 %v2641_v35 }
 0x660   : > { %2509 = vmatpush3.msra.mxu1 %v1807_v19 }
 0x661   : > { %2510 = vmatprep.subr.mxu1 %v2641_v35 }
 0x662   : > { %2511 = vmatpush3.msra.mxu1 %v1806_v52 }
 0x663   : > { %2512 = vmatprep.subr.mxu1 %v2641_v35 }
 0x664   : > { %2513 = vmatpush3.msra.mxu1 %v1805_v53 }
 0x665   : > { %2514 = vmatprep.subr.mxu1 %v2641_v35 }
 0x666   : > { %2515 = vmatpush3.msra.mxu1 %v1804_v39 }
 0x667   : > { %2516 = vmatprep.subr.mxu1 %v2641_v35 }
 0x668   : > { %2517 = vmatpush3.msra.mxu1 %v1803_v14 }
 0x669   : > { %2518 = vmatprep.subr.mxu1 %v2641_v35 }
 0x66a   : > { %2519 = vmatpush3.msra.mxu1 %v1802_v46 }
 0x66b   : > { %2520 = vmatprep.subr.mxu1 %v2641_v35 }
 0x66c   : > { %2521 = vmatpush3.msra.mxu1 %v1801_v20 }
 0x66d   : > { %2522 = vmatprep.subr.mxu1 %v2641_v35 }
 0x66e   : > { %2523 = vmatpush3.msra.mxu1 %v1800_v10 }
 0x66f   : > { %2524 = vmatprep.subr.mxu1 %v2641_v35 }
 0x670   : > { %2525 = vmatpush3.msra.mxu1 %v1799_v55 }
 0x671   : > { %2526 = vmatprep.subr.mxu1 %v2641_v35 }
 0x672   : > { %2527 = vmatpush3.msra.mxu1 %v1798_v22 }
 0x673   : > { %2529 = vmatmul.mubr.f32.vlgmr.msra.gmra.mxu1 %v2147_v44 }
 0x733   : > { %v1882_v4 = vpop.f32.mrf.mxu1 }
 0x734   : > { %v1886_v26 = vsub.f32 %v3159_v25, %v1882_v4 }
 0x735   : > { %v2530_v8 = vpop.f32.mrf.mxu1 }
 0x736   : > { %v1894_v61 = vsub.f32 %v1886_v26, %v1892_v24 }
 0x738   : > { %1895 = vst [vmem:[%s315_s14] sm:$0xff] %v1894_v61 }
 0x739 PF: > { %s15_s22 = sadd.s32 1, %s2638_s22   ;;  %s3286_s18 = smov %s2630_s20 }
 0x73a   : > { %p12_p7 = scmp.ge.s32.totalorder %s15_s22, 34   ;;  %s3287_s19 = smov %s2634_s21 }
 0x73b   : > { %s3288_s20 = smov %s3291_s23  ;;  %s3289_s21 = smov %s3295_s24 }
 0x73c   :  { %14 = sbr.rel (!%p12_p7) target bundleno = 3 (0x3), region = 82 }

</bundles_post_ra>
